<compile_context>
chip_gen: v5e
topology: v5e:2x2
jax: 0.10.0
libtpu: 0.0.40
codegen_flags: <defaults>
</compile_context>

<pallas_src>
import functools

import jax
import jax.numpy as jnp
from jax.experimental import pallas as pl
from jax.experimental.pallas import tpu as pltpu


def _round_up(a, m):
    return ((a + m - 1) // m) * m


# ----------------------------- Pallas kernel ------------------------------ #
def _caam_kernel(num_heads,
                 x_ref,        # (TB, S, D)    concatenated aspects, one tile
                 w_in_ref,     # (D, 3*DP)     in_proj.T, q-cols pre-scaled, lane-padded
                 b_in_ref,     # (1, 3*DP)     in_proj bias, q-part pre-scaled, lane-padded
                 w_out_ref,    # (2D, OUTC)    blockdiag(out_proj.T x2), zero-padded cols
                 b_out_ref,    # (1, OUTC)     [out_bias | out_bias | 0...]
                 w_asp_ref,    # (S, 1)        softmaxed aspect weights, [w; w]
                 mask_ref,     # (H*S, D)      head mask: row h*S+t keeps head-h lanes
                 o_ref):       # (TB, OUTC)    [p1_fused | p2_fused | 0...]
    x = x_ref[...]                                   # (TB, S, D) f32
    TB, S, D = x.shape
    H = num_heads
    A = S // 2
    DP = w_in_ref.shape[1] // 3                      # lane-padded q/k/v block width

    # ---- QKV projection: one (TB*S, D) @ (D, 3*DP) MXU matmul ---------------
    xf = x.reshape(TB * S, D)
    qkv = jnp.dot(xf, w_in_ref[...],
                  preferred_element_type=jnp.float32) + b_in_ref[...]
    # q/k/v blocks start on 128-lane tile boundaries -> no lane rotates.
    q = qkv[:, :D].reshape(TB, S, D)                 # already scaled by 1/sqrt(hd)
    k = qkv[:, DP:DP + D].reshape(TB, S, D)
    v = qkv[:, 2 * DP:2 * DP + D].reshape(TB, S, D)

    # ---- masked key/value stacks (broadcast, no concat copy) ----------------
    mask = mask_ref[...]                             # (H*S, D)
    mask4 = mask.reshape(H, S, D)
    k_stack = (k[:, None, :, :] * mask4[None, :, :, :]).reshape(TB, H * S, D)
    v_stack = (v[:, None, :, :] * mask4[None, :, :, :]).reshape(TB, H * S, D)

    # ---- scores with the merged (head, key) index on LANES ------------------
    # scores[b, s, h*S+t] = <q_h[b,s], k_h[b,t]>  (masked lanes contribute 0)
    scores = jax.lax.dot_general(q, k_stack, (((2,), (2,)), ((0,), (0,))),
                                 preferred_element_type=jnp.float32)  # (TB, S, H*S)

    # Per-(b, s) global max is a valid shift for every head's softmax
    # (softmax is invariant to any per-(b,s,h) constant) and keeps exp args <= 0.
    m = jnp.max(scores, axis=-1, keepdims=True)      # (TB, S, 1)
    e = jnp.exp(scores - m)                          # 64-lane-dense EUP work

    # Per-head denominators broadcast onto head-lane groups via one small
    # matmul with the 0/1 head mask: l_lanes[b,s,d] = sum_t e[b,s,(d//hd)*S+t].
    e2 = e.reshape(TB * S, H * S)
    l_lanes = jnp.dot(e2, mask,
                      preferred_element_type=jnp.float32).reshape(TB, S, D)
    l_lanes = jnp.maximum(l_lanes, 1e-30)            # guard degenerate underflow

    # Unnormalized attention output: the single contraction over (head, key)
    # also performs the per-head lane selection and head concatenation.
    out_un = jax.lax.dot_general(e, v_stack, (((2,), (1,)), ((0,), (0,))),
                                 preferred_element_type=jnp.float32)  # (TB, S, D)

    r = pl.reciprocal(l_lanes, approx=True)
    r = r * (2.0 - l_lanes * r)                      # one Newton step -> ~f32 exact
    out = out_un * r                                 # == concatenated-head MHA output

    # ---- aspect combine BEFORE the output projection ------------------------
    # (exact: the combine is linear and the softmax weights sum to 1)
    wout = out * w_asp_ref[...][None, :, :]          # (TB, S, D)
    p1c = jnp.sum(wout[:, :A, :], axis=1)            # (TB, D)
    p2c = jnp.sum(wout[:, A:, :], axis=1)            # (TB, D)

    # ---- output projection: lane-dense, unmasked single store ---------------
    pcat = jnp.concatenate([p1c, p2c], axis=-1)      # (TB, 2D)
    o_ref[...] = (jnp.dot(pcat, w_out_ref[...],
                          preferred_element_type=jnp.float32) + b_out_ref[...])


# ------------------------------- wrapper ----------------------------------- #
def caam_pallas(p1_aspects, p2_aspects, W_in, b_in, W_out, b_out, aw,
                num_heads=8, tile_b=128, vmem_limit_bytes=48 * 1024 * 1024):
    B, A, D = p1_aspects.shape
    S = 2 * A
    H = num_heads
    hd = D // H
    assert A == 4 and D % H == 0

    x = jnp.concatenate([p1_aspects, p2_aspects], axis=1).astype(jnp.float32)

    # Batch tiling: one step for tiny batches, tile_b (multiple of 8) otherwise.
    TB = min(_round_up(B, 8), _round_up(tile_b, 8))
    n_tiles = pl.cdiv(B, TB)
    B_pad = n_tiles * TB
    if B_pad != B:
        x = jnp.pad(x, ((0, B_pad - B), (0, 0), (0, 0)))

    scale = 1.0 / (hd ** 0.5)

    # in-projection: transpose, fold the attention scale into the q block, and
    # zero-pad each of the q/k/v column blocks to a 128-lane boundary so the
    # in-kernel slices are lane-tile aligned.
    DP = _round_up(D, 128)
    w_in_t = W_in.T.astype(jnp.float32)                               # (D, 3D)
    pad_cols = lambda w: jnp.pad(w, ((0, 0), (0, DP - D)))
    w_in_pad = jnp.concatenate([pad_cols(w_in_t[:, :D] * scale),
                                pad_cols(w_in_t[:, D:2 * D]),
                                pad_cols(w_in_t[:, 2 * D:])], axis=1)  # (D, 3*DP)
    b_in_f = b_in.astype(jnp.float32)
    pad_vec = lambda u: jnp.pad(u, (0, DP - D))
    b_in_pad = jnp.concatenate([pad_vec(b_in_f[:D] * scale),
                                pad_vec(b_in_f[D:2 * D]),
                                pad_vec(b_in_f[2 * D:])]).reshape(1, 3 * DP)

    # out-projection: block-diagonal (p1/p2 in one matmul), output columns
    # zero-padded to a 128-lane multiple -> unmasked lane-dense stores.
    OUTC = _round_up(2 * D, 128)
    w_out_t = W_out.T.astype(jnp.float32)
    zeros = jnp.zeros((D, D), jnp.float32)
    w_out_big = jnp.concatenate(
        [jnp.concatenate([w_out_t, zeros], axis=1),
         jnp.concatenate([zeros, w_out_t], axis=1)], axis=0)          # (2D, 2D)
    w_out_big = jnp.pad(w_out_big, ((0, 0), (0, OUTC - 2 * D)))       # (2D, OUTC)
    b_out_f = b_out.astype(jnp.float32)
    b_out_big = jnp.pad(jnp.concatenate([b_out_f, b_out_f]),
                        (0, OUTC - 2 * D)).reshape(1, OUTC)

    # Aspect-weight softmax hoisted out of the kernel (loop invariant).
    wsm = jax.nn.softmax(aw.astype(jnp.float32))                      # (4,)
    w_asp = jnp.concatenate([wsm, wsm]).reshape(S, 1)                 # (S, 1)

    # Head mask: row h*S+t keeps only the lanes of head h.
    head_of_row = jnp.arange(H * S) // S
    head_of_lane = jnp.arange(D) // hd
    mask = (head_of_row[:, None] == head_of_lane[None, :]).astype(jnp.float32)

    grid_spec = pltpu.PrefetchScalarGridSpec(
        num_scalar_prefetch=0,
        grid=(n_tiles,),
        in_specs=[
            pl.BlockSpec((TB, S, D), lambda i: (i, 0, 0)),
            pl.BlockSpec((D, 3 * DP), lambda i: (0, 0)),
            pl.BlockSpec((1, 3 * DP), lambda i: (0, 0)),
            pl.BlockSpec((2 * D, OUTC), lambda i: (0, 0)),
            pl.BlockSpec((1, OUTC), lambda i: (0, 0)),
            pl.BlockSpec((S, 1), lambda i: (0, 0)),
            pl.BlockSpec((H * S, D), lambda i: (0, 0)),
        ],
        out_specs=pl.BlockSpec((TB, OUTC), lambda i: (i, 0)),
    )
    out_shape = jax.ShapeDtypeStruct((B_pad, OUTC), jnp.float32)

    kernel = functools.partial(_caam_kernel, num_heads)
    res = pl.pallas_call(
        kernel,
        grid_spec=grid_spec,
        out_shape=out_shape,
        compiler_params=pltpu.CompilerParams(
            dimension_semantics=("parallel",),
            vmem_limit_bytes=vmem_limit_bytes),
    )(x, w_in_pad, b_in_pad, w_out_big, b_out_big, w_asp, mask)

    res = res[:B]
    p1_fused = res[:, :D].reshape(B, 1, D)
    p2_fused = res[:, D:2 * D].reshape(B, 1, D)
    return p1_fused, p2_fused


# --------------------------- pure-JAX reference ----------------------------- #
def caam_ref(p1_aspects, p2_aspects, W_in, b_in, W_out, b_out, aw, num_heads=8):
    B, A, D = p1_aspects.shape
    S = 2 * A
    H = num_heads
    hd = D // H
    x = jnp.concatenate([p1_aspects, p2_aspects], axis=1)             # (B, S, D)
    qkv = x @ W_in.T + b_in                                            # (B, S, 3D)
    q, k, v = qkv[..., :D], qkv[..., D:2 * D], qkv[..., 2 * D:]

    def heads(t):
        return t.reshape(B, S, H, hd).transpose(0, 2, 1, 3)            # (B, H, S, hd)

    qh, kh, vh = heads(q), heads(k), heads(v)
    scores = jnp.einsum('bhsd,bhtd->bhst', qh, kh) / (hd ** 0.5)
    attn = jax.nn.softmax(scores, axis=-1)
    o = jnp.einsum('bhst,bhtd->bhsd', attn, vh)
    o = o.transpose(0, 2, 1, 3).reshape(B, S, D)
    attended = o @ W_out.T + b_out
    w = jax.nn.softmax(aw)
    p1_f = jnp.sum(attended[:, :4, :] * w[None, :, None], axis=1, keepdims=True)
    p2_f = jnp.sum(attended[:, 4:, :] * w[None, :, None], axis=1, keepdims=True)
    return p1_f, p2_f


# --------------------------------- main ------------------------------------ #
if __name__ == "__main__":
    B, A, D, H = 16, 4, 32, 8       # input_dim=32, num_heads=8 -> head_dim=4
    key = jax.random.PRNGKey(0)
    k0, k1, k2, k3, k4, k5 = jax.random.split(key, 6)

    p1 = jax.random.normal(k0, (B, A, D), jnp.float32)
    p2 = jax.random.normal(k1, (B, A, D), jnp.float32)

    # Deterministic synthetic parameters (shapes match nn.MultiheadAttention +
    # the learnable aspect weights from CAAM.__init__).
    W_in = jax.random.normal(k2, (3 * D, D), jnp.float32) * (1.0 / (D ** 0.5))
    b_in = jax.random.normal(k3, (3 * D,), jnp.float32) * 0.02
    W_out = jax.random.normal(k4, (D, D), jnp.float32) * (1.0 / (D ** 0.5))
    b_out = jax.random.normal(k5, (D,), jnp.float32) * 0.02
    aw = jnp.ones((4,), jnp.float32)      # matches nn.Parameter(torch.ones(4))

    # Tiny batch -> single grid step (TB = 16, grid=(1,)).
    p1_fused, p2_fused = caam_pallas(p1, p2, W_in, b_in, W_out, b_out, aw,
                                     num_heads=H)
    jax.block_until_ready((p1_fused, p2_fused))

    r1, r2 = caam_ref(p1, p2, W_in, b_in, W_out, b_out, aw, num_heads=H)
    assert p1_fused.shape == (B, 1, D) and p2_fused.shape == (B, 1, D)
    assert jnp.allclose(p1_fused, r1, atol=1e-3, rtol=1e-3)
    assert jnp.allclose(p2_fused, r2, atol=1e-3, rtol=1e-3)

    # Also exercise the multi-step grid + batch-padding path (B=20, TB=8 -> 3 steps).
    kk0, kk1 = jax.random.split(jax.random.PRNGKey(1), 2)
    B2 = 20
    q1 = jax.random.normal(kk0, (B2, A, D), jnp.float32)
    q2 = jax.random.normal(kk1, (B2, A, D), jnp.float32)
    s1, s2 = caam_pallas(q1, q2, W_in, b_in, W_out, b_out, aw,
                         num_heads=H, tile_b=8)
    jax.block_until_ready((s1, s2))
    t1, t2 = caam_ref(q1, q2, W_in, b_in, W_out, b_out, aw, num_heads=H)
    assert jnp.allclose(s1, t1, atol=1e-3, rtol=1e-3)
    assert jnp.allclose(s2, t2, atol=1e-3, rtol=1e-3)

    print("KERNEL_OK")
</pallas_src>

<mosaic_0001>
module attributes {stable_mosaic.version = 11 : i64} {
  func.func @_caam_kernel(%arg0: i32, %arg1: memref<16x8x32xf32, #tpu.memory_space<vmem>>, %arg2: memref<32x384xf32, #tpu.memory_space<vmem>>, %arg3: memref<1x384xf32, #tpu.memory_space<vmem>>, %arg4: memref<64x128xf32, #tpu.memory_space<vmem>>, %arg5: memref<1x128xf32, #tpu.memory_space<vmem>>, %arg6: memref<8x1xf32, #tpu.memory_space<vmem>>, %arg7: memref<64x32xf32, #tpu.memory_space<vmem>>, %arg8: memref<16x128xf32, #tpu.memory_space<vmem>>) attributes {dimension_semantics = [#tpu.dimension_semantics<parallel>], iteration_bounds = array<i64: 1>, scalar_prefetch = 0 : i64, scratch_operands = 0 : i64, tpu.core_type = #tpu.core_type<tc>, window_params = [{transform_indices = @transform_0, window_bounds = array<i64: 16, 8, 32>}, {pipeline_mode = #tpu.pipeline_mode<synchronous>, transform_indices = @transform_1, window_bounds = array<i64: 32, 384>}, {pipeline_mode = #tpu.pipeline_mode<synchronous>, transform_indices = @transform_2, window_bounds = array<i64: 1, 384>}, {pipeline_mode = #tpu.pipeline_mode<synchronous>, transform_indices = @transform_3, window_bounds = array<i64: 64, 128>}, {pipeline_mode = #tpu.pipeline_mode<synchronous>, transform_indices = @transform_4, window_bounds = array<i64: 1, 128>}, {pipeline_mode = #tpu.pipeline_mode<synchronous>, transform_indices = @transform_5, window_bounds = array<i64: 8, 1>}, {pipeline_mode = #tpu.pipeline_mode<synchronous>, transform_indices = @transform_6, window_bounds = array<i64: 64, 32>}, {transform_indices = @transform_7, window_bounds = array<i64: 16, 128>}]} {
    %c0 = arith.constant 0 : index
    %c0_0 = arith.constant 0 : index
    %c0_1 = arith.constant 0 : index
    %0 = vector.load %arg1[%c0, %c0_0, %c0_1] : memref<16x8x32xf32, #tpu.memory_space<vmem>>, vector<16x8x32xf32>
    %1 = vector.shape_cast %0 : vector<16x8x32xf32> to vector<128x32xf32>
    %c0_2 = arith.constant 0 : index
    %c0_3 = arith.constant 0 : index
    %2 = vector.load %arg2[%c0_2, %c0_3] : memref<32x384xf32, #tpu.memory_space<vmem>>, vector<32x384xf32>
    %cst = arith.constant dense<0.000000e+00> : vector<128x384xf32>
    %3 = tpu.matmul %1, %2, %cst {dimension_numbers = #tpu.dot_dimension_numbers<[1], [0], [0], [1], [0, 0, 1, 1], [], []>} : vector<128x32xf32>, vector<32x384xf32>, vector<128x384xf32> -> vector<128x384xf32>
    %c0_4 = arith.constant 0 : index
    %c0_5 = arith.constant 0 : index
    %4 = vector.load %arg3[%c0_4, %c0_5] : memref<1x384xf32, #tpu.memory_space<vmem>>, vector<1x384xf32>
    %5 = vector.broadcast %4 : vector<1x384xf32> to vector<128x384xf32>
    %6 = arith.addf %3, %5 : vector<128x384xf32>
    %7 = vector.extract_strided_slice %6 {offsets = [0, 0], sizes = [128, 32], strides = [1, 1]} : vector<128x384xf32> to vector<128x32xf32>
    %8 = vector.shape_cast %7 : vector<128x32xf32> to vector<16x8x32xf32>
    %9 = vector.extract_strided_slice %6 {offsets = [0, 128], sizes = [128, 32], strides = [1, 1]} : vector<128x384xf32> to vector<128x32xf32>
    %10 = vector.shape_cast %9 : vector<128x32xf32> to vector<16x8x32xf32>
    %11 = vector.extract_strided_slice %6 {offsets = [0, 256], sizes = [128, 32], strides = [1, 1]} : vector<128x384xf32> to vector<128x32xf32>
    %12 = vector.shape_cast %11 : vector<128x32xf32> to vector<16x8x32xf32>
    %c0_6 = arith.constant 0 : index
    %c0_7 = arith.constant 0 : index
    %13 = vector.load %arg7[%c0_6, %c0_7] : memref<64x32xf32, #tpu.memory_space<vmem>>, vector<64x32xf32>
    %14 = vector.shape_cast %13 : vector<64x32xf32> to vector<8x8x32xf32>
    %15 = vector.shape_cast %10 : vector<16x8x32xf32> to vector<16x1x8x32xf32>
    %16 = vector.shape_cast %14 : vector<8x8x32xf32> to vector<1x8x8x32xf32>
    %17 = vector.broadcast %15 : vector<16x1x8x32xf32> to vector<16x8x8x32xf32>
    %18 = vector.broadcast %16 : vector<1x8x8x32xf32> to vector<16x8x8x32xf32>
    %19 = arith.mulf %17, %18 : vector<16x8x8x32xf32>
    %20 = vector.shape_cast %19 : vector<16x8x8x32xf32> to vector<16x64x32xf32>
    %21 = vector.shape_cast %12 : vector<16x8x32xf32> to vector<16x1x8x32xf32>
    %22 = vector.shape_cast %14 : vector<8x8x32xf32> to vector<1x8x8x32xf32>
    %23 = vector.broadcast %21 : vector<16x1x8x32xf32> to vector<16x8x8x32xf32>
    %24 = vector.broadcast %22 : vector<1x8x8x32xf32> to vector<16x8x8x32xf32>
    %25 = arith.mulf %23, %24 : vector<16x8x8x32xf32>
    %26 = vector.shape_cast %25 : vector<16x8x8x32xf32> to vector<16x64x32xf32>
    %cst_8 = arith.constant dense<0.000000e+00> : vector<16x8x64xf32>
    %27 = tpu.matmul %8, %20, %cst_8 {dimension_numbers = #tpu.dot_dimension_numbers<[2], [2], [1], [1], [0, 0, 0, 1, 1, 1], [0], [0]>} : vector<16x8x32xf32>, vector<16x64x32xf32>, vector<16x8x64xf32> -> vector<16x8x64xf32>
    %cst_9 = arith.constant dense<0xFF800000> : vector<16x8xf32>
    %28 = vector.multi_reduction <maximumf>, %27, %cst_9 [2] : vector<16x8x64xf32> to vector<16x8xf32>
    %29 = vector.shape_cast %28 : vector<16x8xf32> to vector<16x8x1xf32>
    %30 = vector.broadcast %29 : vector<16x8x1xf32> to vector<16x8x64xf32>
    %31 = arith.subf %27, %30 : vector<16x8x64xf32>
    %32 = math.exp %31 : vector<16x8x64xf32>
    %33 = vector.shape_cast %32 : vector<16x8x64xf32> to vector<128x64xf32>
    %cst_10 = arith.constant dense<0.000000e+00> : vector<128x32xf32>
    %34 = tpu.matmul %33, %13, %cst_10 {dimension_numbers = #tpu.dot_dimension_numbers<[1], [0], [0], [1], [0, 0, 1, 1], [], []>} : vector<128x64xf32>, vector<64x32xf32>, vector<128x32xf32> -> vector<128x32xf32>
    %35 = vector.shape_cast %34 : vector<128x32xf32> to vector<16x8x32xf32>
    %cst_11 = arith.constant 1.000000e-30 : f32
    %36 = vector.broadcast %cst_11 : f32 to vector<16x8x32xf32>
    %37 = arith.maximumf %35, %36 : vector<16x8x32xf32>
    %cst_12 = arith.constant dense<0.000000e+00> : vector<16x8x32xf32>
    %38 = tpu.matmul %32, %26, %cst_12 {dimension_numbers = #tpu.dot_dimension_numbers<[2], [1], [1], [2], [0, 0, 0, 1, 1, 2], [0], [0]>} : vector<16x8x64xf32>, vector<16x64x32xf32>, vector<16x8x32xf32> -> vector<16x8x32xf32>
    %39 = tpu.reciprocal %37 {approx = true} : vector<16x8x32xf32> -> vector<16x8x32xf32>
    %40 = arith.mulf %37, %39 : vector<16x8x32xf32>
    %cst_13 = arith.constant 2.000000e+00 : f32
    %41 = vector.broadcast %cst_13 : f32 to vector<16x8x32xf32>
    %42 = arith.subf %41, %40 : vector<16x8x32xf32>
    %43 = arith.mulf %39, %42 : vector<16x8x32xf32>
    %44 = arith.mulf %38, %43 : vector<16x8x32xf32>
    %c0_14 = arith.constant 0 : index
    %c0_15 = arith.constant 0 : index
    %45 = vector.load %arg6[%c0_14, %c0_15] : memref<8x1xf32, #tpu.memory_space<vmem>>, vector<8x1xf32>
    %46 = vector.shape_cast %45 : vector<8x1xf32> to vector<1x8x1xf32>
    %47 = vector.broadcast %46 : vector<1x8x1xf32> to vector<16x8x32xf32>
    %48 = arith.mulf %44, %47 : vector<16x8x32xf32>
    %49 = vector.extract_strided_slice %48 {offsets = [0, 0, 0], sizes = [16, 4, 32], strides = [1, 1, 1]} : vector<16x8x32xf32> to vector<16x4x32xf32>
    %cst_16 = arith.constant dense<0.000000e+00> : vector<16x32xf32>
    %50 = vector.multi_reduction <add>, %49, %cst_16 [1] : vector<16x4x32xf32> to vector<16x32xf32>
    %51 = vector.extract_strided_slice %48 {offsets = [0, 4, 0], sizes = [16, 4, 32], strides = [1, 1, 1]} : vector<16x8x32xf32> to vector<16x4x32xf32>
    %cst_17 = arith.constant dense<0.000000e+00> : vector<16x32xf32>
    %52 = vector.multi_reduction <add>, %51, %cst_17 [1] : vector<16x4x32xf32> to vector<16x32xf32>
    %53 = tpu.concatenate %50, %52 in 1 : vector<16x32xf32>, vector<16x32xf32> -> vector<16x64xf32>
    %c0_18 = arith.constant 0 : index
    %c0_19 = arith.constant 0 : index
    %54 = vector.load %arg4[%c0_18, %c0_19] : memref<64x128xf32, #tpu.memory_space<vmem>>, vector<64x128xf32>
    %cst_20 = arith.constant dense<0.000000e+00> : vector<16x128xf32>
    %55 = tpu.matmul %53, %54, %cst_20 {dimension_numbers = #tpu.dot_dimension_numbers<[1], [0], [0], [1], [0, 0, 1, 1], [], []>} : vector<16x64xf32>, vector<64x128xf32>, vector<16x128xf32> -> vector<16x128xf32>
    %c0_21 = arith.constant 0 : index
    %c0_22 = arith.constant 0 : index
    %56 = vector.load %arg5[%c0_21, %c0_22] : memref<1x128xf32, #tpu.memory_space<vmem>>, vector<1x128xf32>
    %57 = vector.broadcast %56 : vector<1x128xf32> to vector<16x128xf32>
    %58 = arith.addf %55, %57 : vector<16x128xf32>
    %c0_23 = arith.constant 0 : index
    %c0_24 = arith.constant 0 : index
    %59 = vector.load %arg8[%c0_23, %c0_24] : memref<16x128xf32, #tpu.memory_space<vmem>>, vector<16x128xf32>
    tpu.vector_store %arg8[%c0_23, %c0_24], %58 {strides = array<i32>} : memref<16x128xf32, #tpu.memory_space<vmem>>, vector<16x128xf32>,
    return
  }
  func.func @transform_0(%arg0: i32) -> (i32, i32, i32) {
    %c0_i32 = arith.constant 0 : i32
    %c0_i32_0 = arith.constant 0 : i32
    %c0_i32_1 = arith.constant 0 : i32
    return %arg0, %c0_i32, %c0_i32_0 : i32, i32, i32
  }
  func.func @transform_1(%arg0: i32) -> (i32, i32) {
    %c0_i32 = arith.constant 0 : i32
    %c0_i32_0 = arith.constant 0 : i32
    %c0_i32_1 = arith.constant 0 : i32
    return %c0_i32, %c0_i32_0 : i32, i32
  }
  func.func @transform_2(%arg0: i32) -> (i32, i32) {
    %c0_i32 = arith.constant 0 : i32
    %c0_i32_0 = arith.constant 0 : i32
    %c0_i32_1 = arith.constant 0 : i32
    return %c0_i32, %c0_i32_0 : i32, i32
  }
  func.func @transform_3(%arg0: i32) -> (i32, i32) {
    %c0_i32 = arith.constant 0 : i32
    %c0_i32_0 = arith.constant 0 : i32
    %c0_i32_1 = arith.constant 0 : i32
    return %c0_i32, %c0_i32_0 : i32, i32
  }
  func.func @transform_4(%arg0: i32) -> (i32, i32) {
    %c0_i32 = arith.constant 0 : i32
    %c0_i32_0 = arith.constant 0 : i32
    %c0_i32_1 = arith.constant 0 : i32
    return %c0_i32, %c0_i32_0 : i32, i32
  }
  func.func @transform_5(%arg0: i32) -> (i32, i32) {
    %c0_i32 = arith.constant 0 : i32
    %c0_i32_0 = arith.constant 0 : i32
    %c0_i32_1 = arith.constant 0 : i32
    return %c0_i32, %c0_i32_0 : i32, i32
  }
  func.func @transform_6(%arg0: i32) -> (i32, i32) {
    %c0_i32 = arith.constant 0 : i32
    %c0_i32_0 = arith.constant 0 : i32
    %c0_i32_1 = arith.constant 0 : i32
    return %c0_i32, %c0_i32_0 : i32, i32
  }
  func.func @transform_7(%arg0: i32) -> (i32, i32) {
    %c0_i32 = arith.constant 0 : i32
    %c0_i32_0 = arith.constant 0 : i32
    return %arg0, %c0_i32 : i32, i32
  }
}

</mosaic_0001>

<bundles_post_ra>
// kernel: tpu_custom_call.1
= control target key start
LH: loop header
LB: loop body
LE: loop exit
PB: predicated region body
PF: predicated region fallthrough
CT: control target
= control target key end

     0   :  { %12 = vsyncpa [#allocation3], 0  ;;  %s3997_s0 = inlined_call_operand.hbm [shape: f32[16,8,32], index: 0, kind: input, shape index: {}]   ;;  %s3998_s1 = inlined_call_operand.vmem [shape: f32[32,384], index: 1, kind: input, shape index: {}]   ;;  %s3999_s2 = inlined_call_operand.vmem [shape: f32[1,384], index: 2, kind: input, shape index: {}]   ;;  %s4000_s3 = inlined_call_operand.hbm [shape: f32[64,128], index: 3, kind: input, shape index: {}]   ;;  %s4001_s4 = inlined_call_operand.vmem [shape: f32[1,128], index: 4, kind: input, shape index: {}]   ;;  %s4002_s5 = inlined_call_operand.vmem [shape: f32[8,1], index: 5, kind: input, shape index: {}]   ;;  %s4003_s6 = inlined_call_operand.vmem [shape: f32[64,32], index: 6, kind: input, shape index: {}]   ;;  %s4004_s7 = inlined_call_operand.hbm [shape: f32[16,128], index: 7, kind: output, shape index: {}]  }
   0x1   :  { %13 = vsyncpa [#allocation6], 0 }
   0x2   :  { %14 = vsyncpa [#allocation4], 0  ;;  %s19_s26 = sshll.u32 %s3997_s0, 4  ;;  %s2810_s27 = smov [#allocation2]   ;;  %s20_s26 = int_to_ptr.hbm [resolvable:$true] %s19_s26 }
   0x3   :  { %s21_s28 = sshll.u32 %s2810_s27, 4  ;;  %s36_s8 = sshll.u32 %s4000_s3, 4  ;;  %s22_s28 = int_to_ptr.vmem [resolvable:$true] %s21_s28  ;;  %s37_s8 = int_to_ptr.hbm [resolvable:$true] %s36_s8 }
   0x4   :  { %s2811_s9 = smov 128   ;;  %s2812_s10 = smov 8  }
   0x5   :  { %27 = dma.hbm_to_vmem [thread:$0]  %s20_s26, 2048, %s22_s28, [#allocation3], %s2811_s9, %s2811_s9, %s2812_s10  }
   0x6   :  { %s2813_s11 = smov [#allocation5]  }
   0x7   :  { %s38_s12 = sshll.u32 %s2813_s11, 4  ;;  %s39_s12 = int_to_ptr.vmem [resolvable:$true] %s38_s12 }
   0x8   :  { %44 = dma.hbm_to_vmem [thread:$0]  %s37_s8, 1024, %s39_s12, [#allocation6], %s2811_s9, %s2811_s9, %s2812_s10  }
   0x9   :  { %2804 = dma.done.wait [#allocation3], 2048  }
   0xa   :  { %2805 = vsyncadd [#allocation3], 4294965248 }
   0xb   :  { %2806 = dma.done.wait [#allocation6], 1024  }
   0xc   :  { %2807 = vsyncadd [#allocation6], 4294966272  ;;  %v84_v0 = vld [vmem:[%s3998_s1 + $0x48] sm:$0xff]  ;;  %v81_v1 = vld [vmem:[%s3998_s1 + $0x30] sm:$0xff]  ;;  %vm95_vm0 = vcmask 261120   ;;  %vm1355_vm1 = vcmask 523264  }
   0xd   :  { %2642 = vmatpush.msra.mxu1 %v84_v0  ;;  %156 = vmatpush.msra.mxu0 %v84_v0  ;;  %v78_v2 = vld [vmem:[%s3998_s1 + $0x18] sm:$0xff]  ;;  %v75_v3 = vld [vmem:[%s3998_s1] sm:$0xff]  ;;  %v2881_v4 = vld [vmem:[#allocation2 + $0x68] sm:$0xff]  ;;  %vm2003_vm2 = vcmask 257024   ;;  %vm2292_vm3 = vcmask 1041409   ;;  %vm2294_vm4 = vcmask 1042434  }
   0xe   :  { %2643 = vmatpush.msra.mxu2 %v84_v0  ;;  %v85_v5 = vld [vmem:[%s3998_s1 + $0x50] sm:$0xff]  ;;  %v59_v6 = vld [vmem:[#allocation2] sm:$0xff]  ;;  %v82_v7 = vld [vmem:[%s3998_s1 + $0x38] sm:$0xff]  ;;  %vm2296_vm5 = vcmask 1043459   ;;  %vm2298_vm6 = vcmask 1044484   ;;  %vm2300_vm7 = vcmask 1045509  }
   0xf   :  { %2644 = vmatpush.msra.mxu1 %v81_v1  ;;  %157 = vmatpush.msra.mxu0 %v81_v1  ;;  %v79_v8 = vld [vmem:[%s3998_s1 + $0x20] sm:$0xff]  ;;  %v76_v9 = vld [vmem:[%s3998_s1 + $0x8] sm:$0xff]  ;;  %v61_v11 = vld [vmem:[#allocation2 + $0x10] sm:$0xff]  ;;  %vm2302_vm8 = vcmask 1046534   ;;  %vm2304_vm9 = vcmask 1047559   ;;  %s2816_s22 = smov [#allocation7]  }
  0x10   :  { %2645 = vmatpush.msra.mxu2 %v81_v1  ;;  %v60_v10 = vld [vmem:[#allocation2 + $0x8] sm:$0xff]  ;;  %v62_v12 = vld [vmem:[#allocation2 + $0x18] sm:$0xff]  ;;  %v63_v13 = vld [vmem:[#allocation2 + $0x20] sm:$0xff]  ;;  %s2400_s23 = sshll.u32 %s2816_s22, 4  ;;  %s2402_s26 = sshll.u32 %s4004_s7, 4  ;;  %s2401_s23 = int_to_ptr.vmem [resolvable:$true] %s2400_s23  ;;  %s2403_s26 = int_to_ptr.hbm [resolvable:$true] %s2402_s26 }
  0x11   :  { %2646 = vmatpush.msra.mxu1 %v78_v2  ;;  %158 = vmatpush.msra.mxu0 %v78_v2  ;;  %v64_v14 = vld [vmem:[#allocation2 + $0x28] sm:$0xff]  ;;  %v2907_v15 = vld [vmem:[#allocation2 + $0x70] sm:$0xff]  ;;  %v2913_v17 = vld [vmem:[#allocation2 + $0x78] sm:$0xff] }
  0x12   :  { %2647 = vmatpush.msra.mxu2 %v78_v2  ;;  %v65_v16 = vld [vmem:[#allocation2 + $0x30] sm:$0xff]  ;;  %v86_v18 = vld [vmem:[%s3998_s1 + $0x58] sm:$0xff]  ;;  %v83_v19 = vld [vmem:[%s3998_s1 + $0x40] sm:$0xff] }
  0x13   :  { %2648 = vmatpush.msra.mxu1 %v75_v3  ;;  %159 = vmatpush.msra.mxu0 %v75_v3  ;;  %v80_v20 = vld [vmem:[%s3998_s1 + $0x28] sm:$0xff]  ;;  %v77_v21 = vld [vmem:[%s3998_s1 + $0x10] sm:$0xff]  ;;  %v66_v22 = vld [vmem:[#allocation2 + $0x38] sm:$0xff] }
  0x14   :  { %2429 = vmatmul.msk.f32.vlgmr.msra.gmra.mxu1 %vm95_vm0, %v2881_v4  ;;  %2416 = vmatmul.msk.f32.vlgmr.msra.gmra.mxu0 %vm95_vm0, %v59_v6  ;;  %v67_v23 = vld [vmem:[#allocation2 + $0x40] sm:$0xff]  ;;  %v68_v24 = vld [vmem:[#allocation2 + $0x48] sm:$0xff]  ;;  %v69_v25 = vld [vmem:[#allocation2 + $0x50] sm:$0xff] }
  0x15   :  { %221 = vmatpush.msrb.mxu1 %v85_v5  ;;  %2649 = vmatpush.msra.mxu2 %v75_v3  ;;  %v70_v26 = vld [vmem:[#allocation2 + $0x58] sm:$0xff]  ;;  %v71_v27 = vld [vmem:[#allocation2 + $0x60] sm:$0xff]  ;;  %v2979_v35 = vld [vmem:[%s4003_s6 + $0x30] sm:$0xff] }
  0x16   :  { %2430 = vmatmul.msk.f32.vlgmr.msra.gmra.mxu2 %vm95_vm0, %v2907_v15  ;;  %v2963_v29 = vld [vmem:[%s3999_s2] sm:$0x7]  ;;  %v2972_v32 = vld [vmem:[%s4003_s6 + $0x38] sm:$0xff]  ;;  %v2987_v39 = vld [vmem:[%s4003_s6 + $0x28] sm:$0xff] }
  0x17   :  { %222 = vmatpush.msrb.mxu1 %v82_v7  ;;  %286 = vmatpush.msrb.mxu2 %v86_v18  ;;  %v2967_v30 = vperm.slane %v2963_v29, 1  ;;  %v2994_v41 = vld [vmem:[%s4003_s6 + $0x20] sm:$0xff]  ;;  %v3006_v45 = vld [vmem:[%s4003_s6 + $0x18] sm:$0xff]  ;;  %v3013_v47 = vld [vmem:[%s4003_s6 + $0x10] sm:$0xff]  ;;  %v3041_v55 = vperm.slane %v2963_v29, 0 }
  0x18   :  { %v3023_v50 = vld [vmem:[%s4003_s6 + $0x8] sm:$0xff]  ;;  %v3035_v54 = vld [vmem:[%s4003_s6] sm:$0xff] }
  0x19   :  { %223 = vmatpush.msrb.mxu1 %v79_v8  ;;  %287 = vmatpush.msrb.mxu2 %v83_v19 }
  0x1b   :  { %224 = vmatpush.msrb.mxu1 %v76_v9  ;;  %288 = vmatpush.msrb.mxu2 %v80_v20 }
  0x1c   :  { %2432 = vmatmul.msk.f32.vlgmr.msrb.gmra.mxu1 %vm95_vm0, %v59_v6  ;;  %2417 = vmatmul.msk.f32.gmra.mxu0 %vm95_vm0, %v60_v10 }
  0x1d   :  { %289 = vmatpush.msrb.mxu2 %v77_v21 }
  0x1e   :  { %2431 = vmatmul.msk.f32.gmra.mxu2 %vm95_vm0, %v2913_v17 }
  0x24   :  { %2433 = vmatmul.msk.f32.gmra.mxu1 %vm95_vm0, %v60_v10  ;;  %2418 = vmatmul.msk.f32.gmra.mxu0 %vm95_vm0, %v61_v11 }
  0x26   :  { %2448 = vmatmul.msk.f32.vlgmr.msrb.gmra.mxu2 %vm95_vm0, %v59_v6 }
  0x2c   :  { %2434 = vmatmul.msk.f32.gmra.mxu1 %vm95_vm0, %v61_v11  ;;  %2419 = vmatmul.msk.f32.gmra.mxu0 %vm95_vm0, %v62_v12 }
  0x2e   :  { %2449 = vmatmul.msk.f32.gmra.mxu2 %vm95_vm0, %v60_v10 }
  0x34   :  { %2435 = vmatmul.msk.f32.gmra.mxu1 %vm95_vm0, %v62_v12  ;;  %2420 = vmatmul.msk.f32.gmra.mxu0 %vm95_vm0, %v63_v13 }
  0x36   :  { %2450 = vmatmul.msk.f32.gmra.mxu2 %vm95_vm0, %v61_v11 }
  0x3c   :  { %2436 = vmatmul.msk.f32.gmra.mxu1 %vm95_vm0, %v63_v13  ;;  %2421 = vmatmul.msk.f32.gmra.mxu0 %vm95_vm0, %v64_v14 }
  0x3e   :  { %2451 = vmatmul.msk.f32.gmra.mxu2 %vm95_vm0, %v62_v12 }
  0x44   :  { %2437 = vmatmul.msk.f32.gmra.mxu1 %vm95_vm0, %v64_v14  ;;  %2422 = vmatmul.msk.f32.gmra.mxu0 %vm95_vm0, %v65_v16 }
  0x46   :  { %2452 = vmatmul.msk.f32.gmra.mxu2 %vm95_vm0, %v63_v13 }
  0x4c   :  { %2438 = vmatmul.msk.f32.gmra.mxu1 %vm95_vm0, %v65_v16  ;;  %2423 = vmatmul.msk.f32.gmra.mxu0 %vm95_vm0, %v66_v22 }
  0x4e   :  { %2453 = vmatmul.msk.f32.gmra.mxu2 %vm95_vm0, %v64_v14 }
  0x54   :  { %2439 = vmatmul.msk.f32.gmra.mxu1 %vm95_vm0, %v66_v22  ;;  %2424 = vmatmul.msk.f32.gmra.mxu0 %vm95_vm0, %v67_v23 }
  0x56   :  { %2454 = vmatmul.msk.f32.gmra.mxu2 %vm95_vm0, %v65_v16 }
  0x5c   :  { %2440 = vmatmul.msk.f32.gmra.mxu1 %vm95_vm0, %v67_v23  ;;  %2425 = vmatmul.msk.f32.gmra.mxu0 %vm95_vm0, %v68_v24 }
  0x5e   :  { %2455 = vmatmul.msk.f32.gmra.mxu2 %vm95_vm0, %v66_v22 }
  0x64   :  { %2441 = vmatmul.msk.f32.gmra.mxu1 %vm95_vm0, %v68_v24  ;;  %2426 = vmatmul.msk.f32.gmra.mxu0 %vm95_vm0, %v69_v25 }
  0x66   :  { %2456 = vmatmul.msk.f32.gmra.mxu2 %vm95_vm0, %v67_v23 }
  0x6c   :  { %2442 = vmatmul.msk.f32.gmra.mxu1 %vm95_vm0, %v69_v25  ;;  %2427 = vmatmul.msk.f32.gmra.mxu0 %vm95_vm0, %v70_v26 }
  0x6e   :  { %2457 = vmatmul.msk.f32.gmra.mxu2 %vm95_vm0, %v68_v24 }
  0x74   :  { %2443 = vmatmul.msk.f32.gmra.mxu1 %vm95_vm0, %v70_v26  ;;  %2428 = vmatmul.msk.f32.gmra.mxu0 %vm95_vm0, %v71_v27 }
  0x76   :  { %2458 = vmatmul.msk.f32.gmra.mxu2 %vm95_vm0, %v69_v25 }
  0x7c   :  { %2444 = vmatmul.msk.f32.gmra.mxu1 %vm95_vm0, %v71_v27 }
  0x7e   :  { %2459 = vmatmul.msk.f32.gmra.mxu2 %vm95_vm0, %v70_v26 }
  0x84   :  { %2445 = vmatmul.msk.f32.gmra.mxu1 %vm95_vm0, %v2881_v4 }
  0x86   :  { %2460 = vmatmul.msk.f32.gmra.mxu2 %vm95_vm0, %v71_v27 }
  0x8c   :  { %2446 = vmatmul.msk.f32.gmra.mxu1 %vm95_vm0, %v2907_v15 }
  0x8e   :  { %2461 = vmatmul.msk.f32.gmra.mxu2 %vm95_vm0, %v2881_v4 }
  0x91   :  { %v2956_v28 = vpop.f32.mrf.mxu1  ;;  %v161_v36 = vpop.f32.mrf.mxu0 }
  0x92   :  { %v162_v59 = vadd.f32 %v161_v36, %v3041_v55 }
  0x94   :  { %2447 = vmatmul.msk.f32.gmra.mxu1 %vm95_vm0, %v2913_v17 }
  0x96   :  { %2462 = vmatmul.msk.f32.gmra.mxu2 %vm95_vm0, %v2907_v15 }
  0x99   :  { %v226_v31 = vpop.f32.mrf.mxu1  ;;  %v2999_v43 = vpop.f32.mrf.mxu0 }
  0x9a   :  { %v227_v33 = vadd.f32 %v226_v31, %v2967_v30  ;;  %v3061_v1 = vpop.f32.mrf.mxu2 }
  0x9c   :  { %v354_v34 = vmul.f32 %v2972_v32, %v227_v33  ;;  %v353_v37 = vmul.f32 %v2979_v35, %v227_v33  ;;  %v352_v40 = vmul.f32 %v2987_v39, %v227_v33  ;;  %v351_v42 = vmul.f32 %v2994_v41, %v227_v33 }
  0x9d   :  { %v350_v46 = vmul.f32 %v3006_v45, %v227_v33  ;;  %v349_v48 = vmul.f32 %v3013_v47, %v227_v33  ;;  %v348_v53 = vmul.f32 %v3023_v50, %v227_v33  ;;  %v347_v57 = vmul.f32 %v3035_v54, %v227_v33 }
  0x9e   :  { %2464 = vmatpush.xpose.msk.msra.mxu3 %vm95_vm0, %v354_v34  ;;  %2463 = vmatmul.msk.f32.gmra.mxu2 %vm95_vm0, %v2913_v17 }
  0xa1   :  { %v229_v38 = vpop.f32.mrf.mxu1  ;;  %v3026_v51 = vpop.f32.mrf.mxu0 }
  0xa2   :  { %2465 = vmatpush.xpose.msk.msra.mxu3 %vm95_vm0, %v353_v37  ;;  %v3029_v52 = vadd.f32 %v229_v38, %v2967_v30  ;;  %v3083_v11 = vpop.f32.mrf.mxu2  ;;  %v165_v37 = vadd.f32 %v2999_v43, %v3041_v55 }
  0xa4   :  { %v362_v56 = vmul.f32 %v2972_v32, %v3029_v52  ;;  %v361_v63 = vmul.f32 %v2979_v35, %v3029_v52  ;;  %v360_v3 = vmul.f32 %v2987_v39, %v3029_v52  ;;  %v359_v7 = vmul.f32 %v2994_v41, %v3029_v52 }
  0xa5   :  { %v358_v13 = vmul.f32 %v3006_v45, %v3029_v52  ;;  %v357_v18 = vmul.f32 %v3013_v47, %v3029_v52  ;;  %v356_v25 = vmul.f32 %v3023_v50, %v3029_v52  ;;  %v355_v36 = vmul.f32 %v3035_v54, %v3029_v52 }
  0xa6   :  { %2466 = vmatpush.xpose.msk.msra.mxu3 %vm95_vm0, %v352_v40 }
  0xa9   :  { %v3001_v44 = vpop.f32.mrf.mxu1  ;;  %v3051_v62 = vpop.f32.mrf.mxu0 }
  0xaa   :  { %2467 = vmatpush.xpose.msk.msra.mxu3 %vm95_vm0, %v351_v42  ;;  %v3111_v22 = vadd.f32 %v3001_v44, %v2967_v30  ;;  %v3117_v26 = vpop.f32.mrf.mxu2 }
  0xac   :  { %v370_v34 = vmul.f32 %v2972_v32, %v3111_v22 }
  0xae   :  { %2468 = vmatpush.xpose.msk.msra.mxu3 %vm95_vm0, %v350_v46 }
  0xb1   :  { %v3018_v49 = vpop.f32.mrf.mxu1  ;;  %v173_v10 = vpop.f32.mrf.mxu0 }
  0xb2   :  { %2469 = vmatpush.xpose.msk.msra.mxu3 %vm95_vm0, %v349_v48  ;;  %v174_v43 = vadd.f32 %v173_v10, %v3041_v55  ;;  %v369_v48 = vmul.f32 %v2979_v35, %v3111_v22  ;;  %v366_v10 = vmul.f32 %v3006_v45, %v3111_v22 }
  0xb6   :  { %2470 = vmatpush.xpose.msk.msra.mxu3 %vm95_vm0, %v348_v53 }
  0xb9   :  { %v238_v58 = vpop.f32.mrf.mxu1  ;;  %v176_v23 = vpop.f32.mrf.mxu0 }
  0xba   :  { %v239_v60 = vadd.f32 %v238_v58, %v2967_v30  ;;  %2471 = vmatpush.xpose.msk.msra.mxu3 %vm95_vm0, %v347_v57  ;;  %v3158_v57 = vpop.f32.mrf.mxu2 }
  0xbc   :  { %v386_v61 = vmul.f32 %v2972_v32, %v239_v60  ;;  %v385_v0 = vmul.f32 %v2979_v35, %v239_v60  ;;  %v384_v5 = vmul.f32 %v2987_v39, %v239_v60  ;;  %v383_v8 = vmul.f32 %v2994_v41, %v239_v60 }
  0xbd   :  { %2472 = vmatmul.msk.f32.vlgmr.msra.gmra.mxu3 %vm95_vm0, %v162_v59  ;;  %v382_v15 = vmul.f32 %v3006_v45, %v239_v60  ;;  %v381_v19 = vmul.f32 %v3013_v47, %v239_v60  ;;  %v380_v27 = vmul.f32 %v3023_v50, %v239_v60  ;;  %v379_v38 = vmul.f32 %v3035_v54, %v239_v60 }
  0xbe   :  { %2473 = vmatpush.xpose.msk.msrb.mxu3 %vm95_vm0, %v362_v56  ;;  %2500 = vmatpush.xpose.msk.msrb.mxu0 %vm95_vm0, %v386_v61  ;;  %v368_v59 = vmul.f32 %v2987_v39, %v3111_v22 }
  0xc1   :  { %v241_v2 = vpop.f32.mrf.mxu1  ;;  %v179_v52 = vpop.f32.mrf.mxu0 }
  0xc2   :  { %2474 = vmatpush.xpose.msk.msrb.mxu3 %vm95_vm0, %v361_v63  ;;  %v3066_v4 = vadd.f32 %v241_v2, %v2967_v30  ;;  %2501 = vmatpush.xpose.msk.msrb.mxu0 %vm95_vm0, %v385_v0 }
  0xc4   :  { %v394_v6 = vmul.f32 %v2972_v32, %v3066_v4  ;;  %v393_v9 = vmul.f32 %v2979_v35, %v3066_v4  ;;  %v392_v16 = vmul.f32 %v2987_v39, %v3066_v4  ;;  %v391_v20 = vmul.f32 %v2994_v41, %v3066_v4 }
  0xc5   :  { %v390_v31 = vmul.f32 %v3006_v45, %v3066_v4  ;;  %v389_v40 = vmul.f32 %v3013_v47, %v3066_v4  ;;  %v388_v53 = vmul.f32 %v3023_v50, %v3066_v4  ;;  %v387_v61 = vmul.f32 %v3035_v54, %v3066_v4 }
  0xc6   :  { %2475 = vmatpush.xpose.msk.msrb.mxu3 %vm95_vm0, %v360_v3  ;;  %2502 = vmatpush.xpose.msk.msrb.mxu0 %vm95_vm0, %v384_v5  ;;  %v177_v3 = vadd.f32 %v176_v23, %v3041_v55  ;;  %v367_v5 = vmul.f32 %v2994_v41, %v3111_v22  ;;  %v3227_v23 = vadd.f32 %v3018_v49, %v2967_v30 }
  0xc7   :  { %2509 = vmatpush.xpose.msk.msra.mxu1 %vm95_vm0, %v394_v6 }
  0xc9   :  { %v244_v12 = vpop.f32.mrf.mxu1 }
  0xca   :  { %2476 = vmatpush.xpose.msk.msrb.mxu3 %vm95_vm0, %v359_v7  ;;  %v3088_v14 = vadd.f32 %v244_v12, %v2967_v30  ;;  %2503 = vmatpush.xpose.msk.msrb.mxu0 %vm95_vm0, %v383_v8  ;;  %v3192_v8 = vpop.f32.mrf.mxu0 }
  0xcb   :  { %2510 = vmatpush.xpose.msk.msra.mxu1 %vm95_vm0, %v393_v9  ;;  %v3194_v9 = vpop.f32.mrf.mxu2 }
  0xcc   :  { %v402_v17 = vmul.f32 %v2972_v32, %v3088_v14  ;;  %v401_v21 = vmul.f32 %v2979_v35, %v3088_v14  ;;  %v400_v33 = vmul.f32 %v2987_v39, %v3088_v14  ;;  %v399_v42 = vmul.f32 %v2994_v41, %v3088_v14 }
  0xcd   :  { %v398_v56 = vmul.f32 %v3006_v45, %v3088_v14  ;;  %v397_v63 = vmul.f32 %v3013_v47, %v3088_v14  ;;  %v396_v4 = vmul.f32 %v3023_v50, %v3088_v14 }
  0xce   :  { %2477 = vmatpush.xpose.msk.msrb.mxu3 %vm95_vm0, %v358_v13  ;;  %2504 = vmatpush.xpose.msk.msrb.mxu0 %vm95_vm0, %v382_v15  ;;  %v395_v13 = vmul.f32 %v3035_v54, %v3088_v14 }
  0xcf   :  { %2511 = vmatpush.xpose.msk.msra.mxu1 %vm95_vm0, %v392_v16  ;;  %2518 = vmatpush.xpose.msk.msra.mxu2 %vm95_vm0, %v402_v17 }
  0xd1   :  { %v3113_v24 = vpop.f32.mrf.mxu1 }
  0xd2   :  { %2478 = vmatpush.xpose.msk.msrb.mxu3 %vm95_vm0, %v357_v18  ;;  %2505 = vmatpush.xpose.msk.msrb.mxu0 %vm95_vm0, %v381_v19  ;;  %v180_v18 = vadd.f32 %v179_v52, %v3041_v55  ;;  %v365_v19 = vmul.f32 %v3013_v47, %v3111_v22 }
  0xd3   :  { %2512 = vmatpush.xpose.msk.msra.mxu1 %vm95_vm0, %v391_v20  ;;  %2519 = vmatpush.xpose.msk.msra.mxu2 %vm95_vm0, %v401_v21 }
  0xd6   :  { %2479 = vmatpush.xpose.msk.msrb.mxu3 %vm95_vm0, %v356_v25  ;;  %2506 = vmatpush.xpose.msk.msrb.mxu0 %vm95_vm0, %v380_v27  ;;  %v364_v25 = vmul.f32 %v3023_v50, %v3111_v22 }
  0xd7   :  { %2513 = vmatpush.xpose.msk.msra.mxu1 %vm95_vm0, %v390_v31  ;;  %2520 = vmatpush.xpose.msk.msra.mxu2 %vm95_vm0, %v400_v33  ;;  %v185_v31 = vpop.f32.mrf.mxu0 }
  0xd9   :  { %v250_v44 = vpop.f32.mrf.mxu1 }
  0xda   :  { %2480 = vmatpush.xpose.msk.msrb.mxu3 %vm95_vm0, %v355_v36  ;;  %v3146_v46 = vadd.f32 %v250_v44, %v2967_v30  ;;  %2507 = vmatpush.xpose.msk.msrb.mxu0 %vm95_vm0, %v379_v38  ;;  %v363_v38 = vmul.f32 %v3035_v54, %v3111_v22 }
  0xdb   :  { %2514 = vmatpush.xpose.msk.msra.mxu1 %vm95_vm0, %v389_v40  ;;  %2521 = vmatpush.xpose.msk.msra.mxu2 %vm95_vm0, %v399_v42  ;;  %v168_v42 = vadd.f32 %v3026_v51, %v3041_v55  ;;  %v377_v51 = vmul.f32 %v2979_v35, %v3227_v23 }
  0xdc   :  { %v418_v58 = vmul.f32 %v2972_v32, %v3146_v46  ;;  %v417_v60 = vmul.f32 %v2979_v35, %v3146_v46  ;;  %v416_v6 = vmul.f32 %v2987_v39, %v3146_v46  ;;  %v415_v12 = vmul.f32 %v2994_v41, %v3146_v46 }
  0xdd   :  { %2481 = vmatmul.msk.f32.vlgmr.msrb.gmra.mxu3 %vm95_vm0, %v165_v37  ;;  %2508 = vmatmul.msk.f32.vlgmr.msrb.gmra.mxu0 %vm95_vm0, %v174_v43  ;;  %v414_v20 = vmul.f32 %v3006_v45, %v3146_v46  ;;  %v413_v27 = vmul.f32 %v3013_v47, %v3146_v46  ;;  %v378_v37 = vmul.f32 %v2972_v32, %v3227_v23 }
  0xde   :  { %2482 = vmatpush.xpose.msk.msra.mxu3 %vm95_vm0, %v370_v34  ;;  %2536 = vmatpush.xpose.msk.msra.mxu0 %vm95_vm0, %v418_v58  ;;  %v3238_v34 = vpop.f32.mrf.mxu2  ;;  %v412_v40 = vmul.f32 %v3023_v50, %v3146_v46  ;;  %v411_v22 = vmul.f32 %v3035_v54, %v3146_v46  ;;  %v186_v46 = vadd.f32 %v185_v31, %v3041_v55 }
  0xdf   :  { %2515 = vmatpush.xpose.msk.msra.mxu1 %vm95_vm0, %v388_v53  ;;  %2522 = vmatpush.xpose.msk.msra.mxu2 %vm95_vm0, %v398_v56  ;;  %v188_v52 = vpop.f32.mrf.mxu0  ;;  %v3340_v31 = vadd.f32 %v3113_v24, %v2967_v30 }
  0xe1   :  { %v253_v0 = vpop.f32.mrf.mxu1 }
  0xe2   :  { %2483 = vmatpush.xpose.msk.msra.mxu3 %vm95_vm0, %v369_v48  ;;  %v3177_v2 = vadd.f32 %v253_v0, %v2967_v30  ;;  %2537 = vmatpush.xpose.msk.msra.mxu0 %vm95_vm0, %v417_v60  ;;  %v376_v60 = vmul.f32 %v2987_v39, %v3227_v23 }
  0xe3   :  { %2516 = vmatpush.xpose.msk.msra.mxu1 %vm95_vm0, %v387_v61  ;;  %2523 = vmatpush.xpose.msk.msra.mxu2 %vm95_vm0, %v397_v63 }
  0xe4   :  { %v426_v7 = vmul.f32 %v2972_v32, %v3177_v2  ;;  %v425_v15 = vmul.f32 %v2979_v35, %v3177_v2  ;;  %v424_v14 = vmul.f32 %v2987_v39, %v3177_v2  ;;  %v423_v33 = vmul.f32 %v2994_v41, %v3177_v2 }
  0xe5   :  { %v422_v44 = vmul.f32 %v3006_v45, %v3177_v2  ;;  %v421_v48 = vmul.f32 %v3013_v47, %v3177_v2  ;;  %v420_v61 = vmul.f32 %v3023_v50, %v3177_v2 }
  0xe6   :  { %2484 = vmatpush.xpose.msk.msra.mxu3 %vm95_vm0, %v368_v59  ;;  %2517 = vmatmul.msk.f32.vlgmr.msra.gmra.mxu1 %vm95_vm0, %v177_v3  ;;  %v3277_v58 = vpop.f32.mrf.mxu2 }
  0xe7   :  { %2538 = vmatpush.xpose.msk.msra.mxu0 %vm95_vm0, %v416_v6  ;;  %2524 = vmatpush.xpose.msk.msra.mxu2 %vm95_vm0, %v396_v4  ;;  %v419_v6 = vmul.f32 %v3035_v54, %v3177_v2  ;;  %v374_v2 = vmul.f32 %v3006_v45, %v3227_v23 }
  0xe8   :  { %2545 = vmatpush.xpose.msk.msrb.mxu1 %vm95_vm0, %v426_v7 }
  0xe9   :  { %v256_v16 = vpop.f32.mrf.mxu1 }
  0xea   :  { %2485 = vmatpush.xpose.msk.msra.mxu3 %vm95_vm0, %v367_v5  ;;  %v3210_v17 = vadd.f32 %v256_v16, %v2967_v30  ;;  %v375_v5 = vmul.f32 %v2994_v41, %v3227_v23 }
  0xeb   :  { %2539 = vmatpush.xpose.msk.msra.mxu0 %vm95_vm0, %v415_v12  ;;  %2525 = vmatpush.xpose.msk.msra.mxu2 %vm95_vm0, %v395_v13  ;;  %v189_v12 = vadd.f32 %v188_v52, %v3041_v55  ;;  %v171_v52 = vadd.f32 %v3051_v62, %v3041_v55 }
  0xec   :  { %2546 = vmatpush.xpose.msk.msrb.mxu1 %vm95_vm0, %v425_v15  ;;  %v434_v21 = vmul.f32 %v2972_v32, %v3210_v17  ;;  %v433_v49 = vmul.f32 %v2979_v35, %v3210_v17  ;;  %v432_v43 = vmul.f32 %v2987_v39, %v3210_v17  ;;  %v431_v53 = vmul.f32 %v2994_v41, %v3210_v17  ;;  %v191_v15 = vpop.f32.mrf.mxu0 }
  0xed   :  { %v430_v0 = vmul.f32 %v3006_v45, %v3210_v17  ;;  %v429_v4 = vmul.f32 %v3013_v47, %v3210_v17 }
  0xee   :  { %2486 = vmatpush.xpose.msk.msra.mxu3 %vm95_vm0, %v366_v10  ;;  %2526 = vmatmul.msk.f32.vlgmr.msra.gmra.mxu2 %vm95_vm0, %v180_v18  ;;  %v3317_v16 = vpop.f32.mrf.mxu2 }
  0xef   :  { %2540 = vmatpush.xpose.msk.msra.mxu0 %vm95_vm0, %v414_v20  ;;  %2554 = vmatpush.xpose.msk.msrb.mxu2 %vm95_vm0, %v434_v21 }
  0xf0   :  { %2547 = vmatpush.xpose.msk.msrb.mxu1 %vm95_vm0, %v424_v14  ;;  %v373_v14 = vmul.f32 %v3013_v47, %v3227_v23 }
  0xf1   :  { %v3244_v36 = vpop.f32.mrf.mxu1 }
  0xf2   :  { %2487 = vmatpush.xpose.msk.msra.mxu3 %vm95_vm0, %v365_v19  ;;  %v428_v19 = vmul.f32 %v3023_v50, %v3210_v17 }
  0xf3   :  { %2541 = vmatpush.xpose.msk.msra.mxu0 %vm95_vm0, %v413_v27  ;;  %2555 = vmatpush.xpose.msk.msrb.mxu2 %vm95_vm0, %v433_v49 }
  0xf4   :  { %2548 = vmatpush.xpose.msk.msrb.mxu1 %vm95_vm0, %v423_v33  ;;  %v3354_v24 = vpop.f32.mrf.mxu0 }
  0xf6   :  { %2488 = vmatpush.xpose.msk.msra.mxu3 %vm95_vm0, %v364_v25  ;;  %v427_v25 = vmul.f32 %v3035_v54, %v3210_v17  ;;  %v372_v17 = vmul.f32 %v3023_v50, %v3227_v23 }
  0xf7   :  { %2542 = vmatpush.xpose.msk.msra.mxu0 %vm95_vm0, %v412_v40  ;;  %2556 = vmatpush.xpose.msk.msrb.mxu2 %vm95_vm0, %v432_v43 }
  0xf8   :  { %2549 = vmatpush.xpose.msk.msrb.mxu1 %vm95_vm0, %v422_v44  ;;  %v410_v44 = vmul.f32 %v2972_v32, %v3340_v31 }
  0xf9   :  { %v262_v56 = vpop.f32.mrf.mxu1 }
  0xfa   :  { %2489 = vmatpush.xpose.msk.msra.mxu3 %vm95_vm0, %v363_v38  ;;  %v3280_v59 = vadd.f32 %v262_v56, %v2967_v30 }
  0xfb   :  { %2543 = vmatpush.xpose.msk.msra.mxu0 %vm95_vm0, %v411_v22  ;;  %2557 = vmatpush.xpose.msk.msrb.mxu2 %vm95_vm0, %v431_v53  ;;  %v371_v22 = vmul.f32 %v3035_v54, %v3227_v23  ;;  %v409_v23 = vmul.f32 %v2979_v35, %v3340_v31 }
  0xfc   :  { %2550 = vmatpush.xpose.msk.msrb.mxu1 %vm95_vm0, %v421_v48  ;;  %v450_v63 = vmul.f32 %v2972_v32, %v3280_v59  ;;  %v449_v3 = vmul.f32 %v2979_v35, %v3280_v59  ;;  %v448_v13 = vmul.f32 %v2987_v39, %v3280_v59  ;;  %v447_v20 = vmul.f32 %v2994_v41, %v3280_v59 }
  0xfd   :  { %2490 = vmatmul.msk.f32.vlgmr.msra.gmra.mxu3 %vm95_vm0, %v168_v42  ;;  %v446_v33 = vmul.f32 %v3006_v45, %v3280_v59  ;;  %v3360_v42 = vpop.f32.mrf.mxu2  ;;  %v445_v43 = vmul.f32 %v3013_v47, %v3280_v59  ;;  %v444_v53 = vmul.f32 %v3023_v50, %v3280_v59 }
  0xfe   :  { %2491 = vmatpush.xpose.msk.msrb.mxu3 %vm95_vm0, %v378_v37  ;;  %2544 = vmatmul.msk.f32.vlgmr.msra.gmra.mxu0 %vm95_vm0, %v186_v46  ;;  %v192_v37 = vadd.f32 %v191_v15, %v3041_v55  ;;  %v197_v46 = vpop.f32.mrf.mxu0 }
  0xff   :  { %2572 = vmatpush.xpose.msk.msrb.mxu0 %vm95_vm0, %v450_v63  ;;  %2558 = vmatpush.xpose.msk.msrb.mxu2 %vm95_vm0, %v430_v0 }
 0x100   :  { %2551 = vmatpush.xpose.msk.msrb.mxu1 %vm95_vm0, %v420_v61 }
 0x101   :  { %v265_v7 = vpop.f32.mrf.mxu1 }
 0x102   :  { %2492 = vmatpush.xpose.msk.msrb.mxu3 %vm95_vm0, %v377_v51  ;;  %v3308_v10 = vadd.f32 %v265_v7, %v2967_v30  ;;  %v407_v7 = vmul.f32 %v2994_v41, %v3340_v31 }
 0x103   :  { %2573 = vmatpush.xpose.msk.msrb.mxu0 %vm95_vm0, %v449_v3  ;;  %2559 = vmatpush.xpose.msk.msrb.mxu2 %vm95_vm0, %v429_v4  ;;  %v3405_v3 = vperm.slane %v2963_v29, 2 }
 0x104   :  { %2552 = vmatpush.xpose.msk.msrb.mxu1 %vm95_vm0, %v419_v6  ;;  %v458_v18 = vmul.f32 %v2972_v32, %v3308_v10  ;;  %v457_v21 = vmul.f32 %v2979_v35, %v3308_v10  ;;  %v456_v38 = vmul.f32 %v2987_v39, %v3308_v10  ;;  %v455_v51 = vmul.f32 %v2994_v41, %v3308_v10 }
 0x105   :  { %v454_v56 = vmul.f32 %v3006_v45, %v3308_v10  ;;  %v453_v61 = vmul.f32 %v3013_v47, %v3308_v10  ;;  %v3399_v63 = vpop.f32.mrf.mxu2  ;;  %v452_v6 = vmul.f32 %v3023_v50, %v3308_v10  ;;  %v292_v4 = vadd.f32 %v3117_v26, %v3405_v3 }
 0x106   :  { %2493 = vmatpush.xpose.msk.msrb.mxu3 %vm95_vm0, %v376_v60  ;;  %v443_v60 = vmul.f32 %v3035_v54, %v3280_v59  ;;  %v198_v59 = vadd.f32 %v197_v46, %v3041_v55 }
 0x107   :  { %2553 = vmatmul.msk.f32.vlgmr.msrb.gmra.mxu1 %vm95_vm0, %v189_v12  ;;  %2574 = vmatpush.xpose.msk.msrb.mxu0 %vm95_vm0, %v448_v13  ;;  %v451_v12 = vmul.f32 %v3035_v54, %v3308_v10  ;;  %v406_v13 = vmul.f32 %v3006_v45, %v3340_v31  ;;  %v482_v15 = vmul.f32 %v2972_v32, %v292_v4 }
 0x108   :  { %2581 = vmatpush.xpose.msk.msra.mxu1 %vm95_vm0, %v458_v18  ;;  %2560 = vmatpush.xpose.msk.msrb.mxu2 %vm95_vm0, %v428_v19  ;;  %v481_v18 = vmul.f32 %v2979_v35, %v292_v4  ;;  %v201_v19 = vadd.f32 %v2956_v28, %v3041_v55 }
 0x109   :  { %v268_v27 = vpop.f32.mrf.mxu1 }
 0x10a   :  { %2494 = vmatpush.xpose.msk.msrb.mxu3 %vm95_vm0, %v375_v5  ;;  %v3346_v49 = vadd.f32 %v268_v27, %v2967_v30  ;;  %v408_v5 = vmul.f32 %v2987_v39, %v3340_v31  ;;  %v404_v27 = vmul.f32 %v3023_v50, %v3340_v31 }
 0x10b   :  { %2575 = vmatpush.xpose.msk.msrb.mxu0 %vm95_vm0, %v447_v20  ;;  %v3449_v20 = vadd.f32 %v3158_v57, %v3405_v3  ;;  %v479_v57 = vmul.f32 %v2994_v41, %v292_v4 }
 0x10c   :  { %2582 = vmatpush.xpose.msk.msra.mxu1 %vm95_vm0, %v457_v21  ;;  %2561 = vmatpush.xpose.msk.msrb.mxu2 %vm95_vm0, %v427_v25  ;;  %v466_v40 = vmul.f32 %v2972_v32, %v3346_v49  ;;  %v465_v48 = vmul.f32 %v2979_v35, %v3346_v49  ;;  %v464_v62 = vmul.f32 %v2987_v39, %v3346_v49 }
 0x10d   :  { %v463_v0 = vmul.f32 %v2994_v41, %v3346_v49  ;;  %v462_v29 = vmul.f32 %v3006_v45, %v3346_v49  ;;  %v461_v26 = vmul.f32 %v3013_v47, %v3346_v49  ;;  %v460_v10 = vmul.f32 %v3023_v50, %v3346_v49 }
 0x10e   :  { %2495 = vmatpush.xpose.msk.msrb.mxu3 %vm95_vm0, %v374_v2  ;;  %v3436_v2 = vpop.f32.mrf.mxu2  ;;  %v480_v21 = vmul.f32 %v2987_v39, %v292_v4  ;;  %v3459_v25 = vadd.f32 %v3244_v36, %v2967_v30  ;;  %v459_v28 = vmul.f32 %v3035_v54, %v3346_v49  ;;  %v478_v36 = vmul.f32 %v3006_v45, %v292_v4 }
 0x10f   :  { %2576 = vmatpush.xpose.msk.msrb.mxu0 %vm95_vm0, %v446_v33  ;;  %2562 = vmatmul.msk.f32.vlgmr.msrb.gmra.mxu2 %vm95_vm0, %v192_v37  ;;  %v490_v33 = vmul.f32 %v2972_v32, %v3449_v20  ;;  %v204_v49 = vadd.f32 %v3061_v1, %v3041_v55  ;;  %v489_v1 = vmul.f32 %v2979_v35, %v3449_v20 }
 0x110   :  { %2590 = vmatpush.xpose.msk.msra.mxu2 %vm95_vm0, %v466_v40  ;;  %2583 = vmatpush.xpose.msk.msra.mxu1 %vm95_vm0, %v456_v38  ;;  %v442_v37 = vmul.f32 %v2972_v32, %v3459_v25  ;;  %v477_v38 = vmul.f32 %v3013_v47, %v292_v4  ;;  %v298_v40 = vadd.f32 %v3194_v9, %v3405_v3 }
 0x111   :  { %v488_v9 = vmul.f32 %v2987_v39, %v3449_v20  ;;  %v440_v46 = vmul.f32 %v2987_v39, %v3459_v25 }
 0x112   :  { %2496 = vmatpush.xpose.msk.msrb.mxu3 %vm95_vm0, %v373_v14  ;;  %v405_v14 = vmul.f32 %v3013_v47, %v3340_v31 }
 0x113   :  { %2577 = vmatpush.xpose.msk.msrb.mxu0 %vm95_vm0, %v445_v43  ;;  %v183_v43 = vadd.f32 %v3192_v8, %v3041_v55  ;;  %v487_v8 = vmul.f32 %v2994_v41, %v3449_v20 }
 0x114   :  { %2584 = vmatpush.xpose.msk.msra.mxu1 %vm95_vm0, %v455_v51  ;;  %2591 = vmatpush.xpose.msk.msra.mxu2 %vm95_vm0, %v465_v48  ;;  %v475_v51 = vmul.f32 %v3035_v54, %v292_v4  ;;  %v498_v48 = vmul.f32 %v2972_v32, %v298_v40 }
 0x116   :  { %2497 = vmatpush.xpose.msk.msrb.mxu3 %vm95_vm0, %v372_v17  ;;  %v3477_v17 = vpop.f32.mrf.mxu2 }
 0x117   :  { %2578 = vmatpush.xpose.msk.msrb.mxu0 %vm95_vm0, %v444_v53  ;;  %v485_v53 = vmul.f32 %v3013_v47, %v3449_v20 }
 0x118   :  { %2585 = vmatpush.xpose.msk.msra.mxu1 %vm95_vm0, %v454_v56  ;;  %2592 = vmatpush.xpose.msk.msra.mxu2 %vm95_vm0, %v464_v62  ;;  %v496_v56 = vmul.f32 %v2987_v39, %v298_v40  ;;  %v301_v62 = vadd.f32 %v3238_v34, %v3405_v3  ;;  %v494_v34 = vmul.f32 %v3006_v45, %v298_v40 }
 0x11a   :  { %2498 = vmatpush.xpose.msk.msrb.mxu3 %vm95_vm0, %v371_v22  ;;  %v476_v22 = vmul.f32 %v3023_v50, %v292_v4  ;;  %v505_v4 = vmul.f32 %v2979_v35, %v301_v62 }
 0x11b   :  { %2579 = vmatpush.xpose.msk.msrb.mxu0 %vm95_vm0, %v443_v60 }
 0x11c   :  { %2586 = vmatpush.xpose.msk.msra.mxu1 %vm95_vm0, %v453_v61  ;;  %2593 = vmatpush.xpose.msk.msra.mxu2 %vm95_vm0, %v463_v0  ;;  %v484_v61 = vmul.f32 %v3023_v50, %v3449_v20  ;;  %v495_v0 = vmul.f32 %v2994_v41, %v298_v40 }
 0x11d   :  { %2499 = vmatmul.msk.f32.vlgmr.msrb.gmra.mxu3 %vm95_vm0, %v171_v52  ;;  %v486_v52 = vmul.f32 %v3006_v45, %v3449_v20 }
 0x11e   :  { %2527 = vmatpush.xpose.msk.msra.mxu3 %vm95_vm0, %v410_v44  ;;  %2580 = vmatmul.msk.f32.vlgmr.msrb.gmra.mxu0 %vm95_vm0, %v198_v59  ;;  %v403_v44 = vmul.f32 %v3035_v54, %v3340_v31  ;;  %v441_v31 = vmul.f32 %v2979_v35, %v3459_v25  ;;  %v3514_v60 = vpop.f32.mrf.mxu2  ;;  %v439_v59 = vmul.f32 %v2994_v41, %v3459_v25 }
 0x11f   :  { %1508 = vmatpush.msra.mxu0 %v2972_v32 }
 0x120   :  { %2587 = vmatpush.xpose.msk.msra.mxu1 %vm95_vm0, %v452_v6  ;;  %2594 = vmatpush.xpose.msk.msra.mxu2 %vm95_vm0, %v462_v29  ;;  %v506_v6 = vmul.f32 %v2972_v32, %v301_v62  ;;  %v493_v29 = vmul.f32 %v3013_v47, %v298_v40 }
 0x121   :  { %1509 = vmatpush.msra.mxu0 %v2979_v35 }
 0x122   :  { %2528 = vmatpush.xpose.msk.msra.mxu3 %vm95_vm0, %v409_v23  ;;  %v497_v23 = vmul.f32 %v2979_v35, %v298_v40 }
 0x123   :  { %1510 = vmatpush.msra.mxu0 %v2987_v39 }
 0x124   :  { %2588 = vmatpush.xpose.msk.msra.mxu1 %vm95_vm0, %v451_v12  ;;  %2595 = vmatpush.xpose.msk.msra.mxu2 %vm95_vm0, %v461_v26  ;;  %v438_v12 = vmul.f32 %v3006_v45, %v3459_v25  ;;  %v504_v26 = vmul.f32 %v2987_v39, %v301_v62 }
 0x125   :  { %1511 = vmatpush.msra.mxu0 %v2994_v41 }
 0x126   :  { %2529 = vmatpush.xpose.msk.msra.mxu3 %vm95_vm0, %v408_v5  ;;  %v483_v5 = vmul.f32 %v3035_v54, %v3449_v20  ;;  %v437_v20 = vmul.f32 %v3013_v47, %v3459_v25 }
 0x127   :  { %1512 = vmatpush.msra.mxu0 %v3006_v45  ;;  %2589 = vmatmul.msk.f32.vlgmr.msra.gmra.mxu1 %vm95_vm0, %v201_v19 }
 0x128   :  { %1589 = vmatpush.msrb.mxu1 %v482_v15  ;;  %2596 = vmatpush.xpose.msk.msra.mxu2 %vm95_vm0, %v460_v10  ;;  %v3535_v15 = vpop.f32.mrf.mxu2  ;;  %v503_v10 = vmul.f32 %v2994_v41, %v301_v62 }
 0x129   :  { %1513 = vmatpush.msra.mxu0 %v3013_v47 }
 0x12a   :  { %2530 = vmatpush.xpose.msk.msra.mxu3 %vm95_vm0, %v407_v7  ;;  %1590 = vmatpush.msrb.mxu1 %v481_v18  ;;  %v492_v7 = vmul.f32 %v3023_v50, %v298_v40 }
 0x12b   :  { %1514 = vmatpush.msra.mxu0 %v3023_v50 }
 0x12c   :  { %1591 = vmatpush.msrb.mxu1 %v480_v21  ;;  %2597 = vmatpush.xpose.msk.msra.mxu2 %vm95_vm0, %v459_v28  ;;  %v502_v21 = vmul.f32 %v3006_v45, %v301_v62  ;;  %v501_v28 = vmul.f32 %v3013_v47, %v301_v62 }
 0x12d   :  { %1515 = vmatpush.msra.mxu0 %v3035_v54 }
 0x12e   :  { %2531 = vmatpush.xpose.msk.msra.mxu3 %vm95_vm0, %v406_v13  ;;  %1592 = vmatpush.msrb.mxu1 %v479_v57  ;;  %v491_v13 = vmul.f32 %v3035_v54, %v298_v40 }
 0x12f   :  { %2598 = vmatmul.msk.f32.vlgmr.msra.gmra.mxu2 %vm95_vm0, %v204_v49 }
 0x130   :  { %1609 = vmatpush.msrb.mxu2 %v490_v33  ;;  %1593 = vmatpush.msrb.mxu1 %v478_v36  ;;  %v500_v33 = vmul.f32 %v3023_v50, %v301_v62  ;;  %v499_v36 = vmul.f32 %v3035_v54, %v301_v62 }
 0x132   :  { %2532 = vmatpush.xpose.msk.msra.mxu3 %vm95_vm0, %v405_v14  ;;  %1594 = vmatpush.msrb.mxu1 %v477_v38  ;;  %v271_v14 = vpop.f32.mrf.mxu1  ;;  %v3556_v38 = vpop.f32.mrf.mxu2 }
 0x133   :  { %1610 = vmatpush.msrb.mxu2 %v489_v1  ;;  %v272_v57 = vadd.f32 %v271_v14, %v2967_v30  ;;  %v195_v30 = vadd.f32 %v3354_v24, %v3041_v55 }
 0x134   :  { %1595 = vmatpush.msrb.mxu1 %v476_v22 }
 0x135   :  { %1611 = vmatpush.msrb.mxu2 %v488_v9  ;;  %v474_v49 = vmul.f32 %v2972_v32, %v272_v57  ;;  %v473_v40 = vmul.f32 %v2979_v35, %v272_v57  ;;  %v471_v1 = vmul.f32 %v2994_v41, %v272_v57 }
 0x136   :  { %2533 = vmatpush.xpose.msk.msra.mxu3 %vm95_vm0, %v404_v27  ;;  %1596 = vmatpush.msrb.mxu1 %v475_v51  ;;  %v436_v27 = vmul.f32 %v3023_v50, %v3459_v25 }
 0x137   :  { %1612 = vmatpush.msrb.mxu2 %v487_v8  ;;  %v469_v8 = vmul.f32 %v3013_v47, %v272_v57 }
 0x138   :  { %1629 = vmatpush.msra.mxu1 %v498_v48  ;;  %v468_v48 = vmul.f32 %v3023_v50, %v272_v57 }
 0x139   :  { %1613 = vmatpush.msrb.mxu2 %v486_v52  ;;  %v304_v52 = vadd.f32 %v3277_v58, %v3405_v3 }
 0x13a   :  { %2534 = vmatpush.xpose.msk.msra.mxu3 %vm95_vm0, %v403_v44  ;;  %1630 = vmatpush.msra.mxu1 %v497_v23  ;;  %v472_v44 = vmul.f32 %v2987_v39, %v272_v57 }
 0x13b   :  { %1614 = vmatpush.msrb.mxu2 %v485_v53  ;;  %v513_v58 = vmul.f32 %v2979_v35, %v304_v52 }
 0x13c   :  { %1631 = vmatpush.msra.mxu1 %v496_v56  ;;  %v467_v56 = vmul.f32 %v3035_v54, %v272_v57 }
 0x13d   :  { %2535 = vmatmul.msk.f32.vlgmr.msra.gmra.mxu3 %vm95_vm0, %v183_v43  ;;  %1615 = vmatpush.msrb.mxu2 %v484_v61  ;;  %v470_v43 = vmul.f32 %v3006_v45, %v272_v57  ;;  %v207_v61 = vadd.f32 %v3083_v11, %v3041_v55  ;;  %v509_v11 = vmul.f32 %v3013_v47, %v304_v52 }
 0x13e   :  { %2563 = vmatpush.xpose.msk.msrb.mxu3 %vm95_vm0, %v442_v37  ;;  %1632 = vmatpush.msra.mxu1 %v495_v0  ;;  %v435_v37 = vmul.f32 %v3035_v54, %v3459_v25  ;;  %v3566_v25 = vpop.f32.mrf.mxu2  ;;  %v512_v0 = vmul.f32 %v2987_v39, %v304_v52 }
 0x13f   :  { %1616 = vmatpush.msrb.mxu2 %v483_v5  ;;  %v511_v5 = vmul.f32 %v2994_v41, %v304_v52 }
 0x140   :  { %1633 = vmatpush.msra.mxu1 %v494_v34  ;;  %v3538_v18 = vpop.f32.mrf.mxu3  ;;  %v510_v34 = vmul.f32 %v3006_v45, %v304_v52 }
 0x141   :  { %1649 = vmatpush.msra.mxu2 %v506_v6  ;;  %v1356_v19 = vsel %vm1355_vm1, %v3538_v18, -inf  ;;  %v313_v6 = vadd.f32 %v3399_v63, %v3405_v3 }
 0x142   :  { %2564 = vmatpush.xpose.msk.msrb.mxu3 %vm95_vm0, %v441_v31  ;;  %1634 = vmatpush.msra.mxu1 %v493_v29  ;;  %v508_v29 = vmul.f32 %v3023_v50, %v304_v52 }
 0x143   :  { %1650 = vmatpush.msra.mxu2 %v505_v4  ;;  %1357 = vmax.xlane.f32.xlu0 %v1356_v19  ;;  %v507_v4 = vmul.f32 %v3035_v54, %v304_v52  ;;  %v536_v19 = vmul.f32 %v2987_v39, %v313_v6  ;;  %v531_v39 = vmul.f32 %v3035_v54, %v313_v6 }
 0x144   :  { %1635 = vmatpush.msra.mxu1 %v492_v7  ;;  %v538_v7 = vmul.f32 %v2972_v32, %v313_v6 }
 0x145   :  { %1651 = vmatpush.msra.mxu2 %v504_v26 }
 0x146   :  { %2565 = vmatpush.xpose.msk.msrb.mxu3 %vm95_vm0, %v440_v46  ;;  %1636 = vmatpush.msra.mxu1 %v491_v13  ;;  %v3579_v31 = vpop.f32.mrf.mxu2  ;;  %v514_v46 = vmul.f32 %v2972_v32, %v304_v52  ;;  %v535_v32 = vmul.f32 %v2994_v41, %v313_v6 }
 0x147   :  { %1652 = vmatpush.msra.mxu2 %v503_v10 }
 0x149   :  { %1653 = vmatpush.msra.mxu2 %v502_v21  ;;  %v532_v21 = vmul.f32 %v3023_v50, %v313_v6 }
 0x14a   :  { %2566 = vmatpush.xpose.msk.msrb.mxu3 %vm95_vm0, %v439_v59 }
 0x14b   :  { %1654 = vmatpush.msra.mxu2 %v501_v28 }
 0x14d   :  { %1655 = vmatpush.msra.mxu2 %v500_v33 }
 0x14e   :  { %2567 = vmatpush.xpose.msk.msrb.mxu3 %vm95_vm0, %v438_v12  ;;  %v3594_v62 = vpop.f32.mrf.mxu2  ;;  %v537_v12 = vmul.f32 %v2979_v35, %v313_v6  ;;  %v534_v35 = vmul.f32 %v3006_v45, %v313_v6 }
 0x14f   :  { %1656 = vmatpush.msra.mxu2 %v499_v36 }
 0x152   :  { %2568 = vmatpush.xpose.msk.msrb.mxu3 %vm95_vm0, %v437_v20  ;;  %v533_v20 = vmul.f32 %v3013_v47, %v313_v6 }
 0x156   :  { %2569 = vmatpush.xpose.msk.msrb.mxu3 %vm95_vm0, %v436_v27 }
 0x15a   :  { %2570 = vmatpush.xpose.msk.msrb.mxu3 %vm95_vm0, %v435_v37  ;;  %v3571_v24 = vpop.f32.mrf.mxu0 }
 0x15b   :  { %v1368_v22 = vsel %vm1355_vm1, %v3571_v24, -inf }
 0x15c   :  { %1369 = vmax.xlane.f32.xlu2 %v1368_v22 }
 0x15d   :  { %2571 = vmatmul.msk.f32.vlgmr.msrb.gmra.mxu3 %vm95_vm0, %v195_v30 }
 0x15e   :  { %2599 = vmatpush.xpose.msk.msra.mxu3 %vm95_vm0, %v474_v49 }
 0x160   :  { %v3577_v9 = vpop.f32.mrf.mxu3 }
 0x161   :  { %v1359_v51 = vsel %vm1355_vm1, %v3577_v9, -inf }
 0x162   :  { %2600 = vmatpush.xpose.msk.msra.mxu3 %vm95_vm0, %v473_v40  ;;  %1360 = vmax.xlane.f32.xlu0 %v1359_v51  ;;  %v307_v40 = vadd.f32 %v3317_v16, %v3405_v3  ;;  %v3666_v16 = vld [vmem:[%s4003_s6 + $0x30] sm:$0xff] }
 0x163   :  { %v3588_v23 = vpop.f32.mrf.mxu1 }
 0x164   :  { %v1371_v53 = vsel %vm1355_vm1, %v3588_v23, -inf  ;;  %v521_v51 = vmul.f32 %v3666_v16, %v307_v40 }
 0x165   :  { %1372 = vmax.xlane.f32.xlu2 %v1371_v53  ;;  %v3680_v53 = vld [vmem:[%s4003_s6 + $0x20] sm:$0xff] }
 0x166   :  { %2601 = vmatpush.xpose.msk.msra.mxu3 %vm95_vm0, %v472_v44  ;;  %v2814_v44 = vmov 0  }
 0x167   :  { %2657 = vset.pattern.permute.xlu1 %v2814_v44  ;;  %2658 = vset.pattern.permute.xlu0 %v2814_v44  ;;  %v3741_v44 = vld [vmem:[%s4003_s6] sm:$0xff] }
 0x16a   :  { %2602 = vmatpush.xpose.msk.msra.mxu3 %vm95_vm0, %v471_v1 }
 0x16e   :  { %2603 = vmatpush.xpose.msk.msra.mxu3 %vm95_vm0, %v470_v43 }
 0x171   :  { %v3605_v59 = vpop.f32.mrf.mxu2 }
 0x172   :  { %2604 = vmatpush.xpose.msk.msra.mxu3 %vm95_vm0, %v469_v8  ;;  %v1374_v55 = vsel %vm1355_vm1, %v3605_v59, -inf  ;;  %v3672_v8 = vld [vmem:[%s4003_s6 + $0x28] sm:$0xff] }
 0x173   :  { %1375 = vmax.xlane.f32.xlu0 %v1374_v55  ;;  %v515_v55 = vmul.f32 %v3035_v54, %v307_v40 }
 0x176   :  { %2605 = vmatpush.xpose.msk.msra.mxu3 %vm95_vm0, %v468_v48  ;;  %v520_v48 = vmul.f32 %v3672_v8, %v307_v40 }
 0x17a   :  { %2606 = vmatpush.xpose.msk.msra.mxu3 %vm95_vm0, %v467_v56  ;;  %v519_v56 = vmul.f32 %v3680_v53, %v307_v40 }
 0x17b   :  { %v3618_v13 = vpop.f32.mrf.mxu0 }
 0x17c   :  { %v1380_v63 = vsel %vm1355_vm1, %v3618_v13, -inf }
 0x17d   :  { %2607 = vmatmul.msk.f32.vlgmr.msra.gmra.mxu3 %vm95_vm0, %v207_v61  ;;  %1381 = vmax.xlane.f32.xlu2 %v1380_v63 }
 0x17e   :  { %1669 = vmatpush.msrb.mxu3 %v514_v46  ;;  %v3686_v46 = vld [vmem:[%s4003_s6 + $0x18] sm:$0xff] }
 0x17f   :  { %v518_v61 = vmul.f32 %v3686_v46, %v307_v40 }
 0x180   :  { %1670 = vmatpush.msrb.mxu3 %v513_v58  ;;  %v3616_v26 = vpop.f32.mrf.mxu3  ;;  %v3692_v58 = vld [vmem:[%s4003_s6 + $0x10] sm:$0xff] }
 0x181   :  { %v1362_v10 = vsel %vm1355_vm1, %v3616_v26, -inf }
 0x182   :  { %1671 = vmatpush.msrb.mxu3 %v512_v0  ;;  %1363 = vmax.xlane.f32.xlu1 %v1362_v10  ;;  %v517_v0 = vmul.f32 %v3692_v58, %v307_v40 }
 0x184   :  { %1672 = vmatpush.msrb.mxu3 %v511_v5  ;;  %v3628_v14 = vpop.f32.mrf.mxu1  ;;  %v3698_v5 = vld [vmem:[%s4003_s6 + $0x8] sm:$0xff] }
 0x185   :  { %v1383_v28 = vsel %vm1355_vm1, %v3628_v14, -inf }
 0x186   :  { %1673 = vmatpush.msrb.mxu3 %v510_v34  ;;  %1384 = vmax.xlane.f32.xlu0 %v1383_v28  ;;  %v516_v34 = vmul.f32 %v3698_v5, %v307_v40 }
 0x188   :  { %1674 = vmatpush.msrb.mxu3 %v509_v11 }
 0x18a   :  { %1675 = vmatpush.msrb.mxu3 %v508_v29 }
 0x18c   :  { %1676 = vmatpush.msrb.mxu3 %v507_v4 }
 0x18e   :  { %1729 = vmatpush.msra.mxu3 %v538_v7 }
 0x190   :  { %1730 = vmatpush.msra.mxu3 %v537_v12 }
 0x192   :  { %1731 = vmatpush.msra.mxu3 %v536_v19  ;;  %v3647_v37 = vpop.f32.mrf.mxu2  ;;  %v322_v19 = vadd.f32 %v3514_v60, %v3405_v3 }
 0x193   :  { %v1386_v30 = vsel %vm1355_vm1, %v3647_v37, -inf }
 0x194   :  { %1732 = vmatpush.msra.mxu3 %v535_v32  ;;  %v310_v32 = vadd.f32 %v3360_v42, %v3405_v3  ;;  %v561_v60 = vmul.f32 %v3666_v16, %v322_v19  ;;  %v560_v28 = vmul.f32 %v3672_v8, %v322_v19 }
 0x196   :  { %1733 = vmatpush.msra.mxu3 %v534_v35 }
 0x198   :  { %1734 = vmatpush.msra.mxu3 %v533_v20 }
 0x19a   :  { %1735 = vmatpush.msra.mxu3 %v532_v21 }
 0x19b   :  { %v3638_v47 = vpop.f32.mrf.mxu0 }
 0x19c   :  { %1736 = vmatpush.msra.mxu3 %v531_v39  ;;  %v1392_v57 = vsel %vm1355_vm1, %v3638_v47, -inf  ;;  %v529_v39 = vmul.f32 %v3666_v16, %v310_v32 }
 0x19d   :  { %1393 = vmax.xlane.f32.xlu0 %v1392_v57  ;;  %v528_v57 = vmul.f32 %v3672_v8, %v310_v32 }
 0x1a0   :  { %v3634_v41 = vpop.f32.mrf.mxu3 }
 0x1a1   :  { %v1365_v45 = vsel %vm1355_vm1, %v3634_v41, -inf }
 0x1a2   :  { %1366 = vmax.xlane.f32.xlu1 %v1365_v45  ;;  %v559_v45 = vmul.f32 %v3680_v53, %v322_v19 }
 0x1a4   :  { %v3661_v22 = vpop.f32.mrf.mxu1 }
 0x1a5   :  { %v1395_v52 = vsel %vm1355_vm1, %v3661_v22, -inf }
 0x1b2   :  { %v3710_v54 = vpop.f32.mrf.mxu2 }
 0x1b3   :  { %v1398_v20 = vsel %vm1355_vm1, %v3710_v54, -inf }
 0x1b6   :  { %v1358_v27 = vpop.xlane.xlu0 %1357 }
 0x1b7   :  { %v1404_v36 = vsub.f32 %v3538_v18, %v1358_v27  ;;  %v3656_v18 = vld [vmem:[%s4003_s6 + $0x38] sm:$0xff]  ;;  %v558_v27 = vmul.f32 %v3686_v46, %v322_v19  ;;  %s2815_s6 = smov 32  }
 0x1b8   :  { %v522_v43 = vmul.f32 %v3656_v18, %v307_v40  ;;  %v562_v35 = vmul.f32 %v3656_v18, %v322_v19  ;;  %v530_v42 = vmul.f32 %v3656_v18, %v310_v32  ;;  %v525_v40 = vmul.f32 %v3692_v58, %v310_v32 }
 0x1b9   :  { %v1420_v49 = vmul.f32 1.442695, %v1404_v36  ;;  %v557_v36 = vmul.f32 %v3692_v58, %v322_v19 }
 0x1bb   :  { %2660 = vpow2.f32 %v1420_v49  ;;  %v526_v49 = vmul.f32 %v3686_v46, %v310_v32 }
 0x1c0   :  { %v3642_v50 = vpop.f32.mrf.mxu3 }
 0x1c1   :  { %v1377_v33 = vsel %vm1355_vm1, %v3642_v50, -inf  ;;  %v2661_v1 = vpop.eup %2660 }
 0x1c2   :  { %1378 = vmax.xlane.f32.xlu1 %v1377_v33  ;;  %2608 = vmatmul.msk.f32.vlgmr.msra.gmra.mxu0 %vm1355_vm1, %v2661_v1  ;;  %v527_v33 = vmul.f32 %v3680_v53, %v310_v32 }
 0x1c3   :  { %2624 = vmatmul.msk.f32.vlgmr.msrb.gmra.mxu1 %vm1355_vm1, %v2661_v1  ;;  %v555_v1 = vmul.f32 %v3741_v44, %v322_v19 }
 0x1c4   :  { %1689 = vmatpush.msrb.mxu1 %v522_v43  ;;  %v524_v43 = vmul.f32 %v3698_v5, %v310_v32 }
 0x1c6   :  { %1690 = vmatpush.msrb.mxu1 %v521_v51  ;;  %v523_v51 = vmul.f32 %v3741_v44, %v310_v32 }
 0x1c8   :  { %1691 = vmatpush.msrb.mxu1 %v520_v48 }
 0x1ca   :  { %1387 = vmax.xlane.f32.xlu1 %v1386_v30  ;;  %1692 = vmatpush.msrb.mxu1 %v519_v56  ;;  %v556_v30 = vmul.f32 %v3698_v5, %v322_v19 }
 0x1cc   :  { %1693 = vmatpush.msrb.mxu1 %v518_v61 }
 0x1ce   :  { %1694 = vmatpush.msrb.mxu1 %v517_v0 }
 0x1cf   :  { %v1370_v11 = vpop.xlane.xlu2 %1369 }
 0x1d0   :  { %1695 = vmatpush.msrb.mxu1 %v516_v34  ;;  %v1408_v6 = vsub.f32 %v3571_v24, %v1370_v11  ;;  %v316_v11 = vadd.f32 %v3436_v2, %v3405_v3 }
 0x1d2   :  { %1396 = vmax.xlane.f32.xlu1 %v1395_v52  ;;  %1696 = vmatpush.msrb.mxu1 %v515_v55  ;;  %v1428_v4 = vmul.f32 1.442695, %v1408_v6  ;;  %v543_v2 = vmul.f32 %v3680_v53, %v316_v11  ;;  %v542_v32 = vmul.f32 %v3686_v46, %v316_v11 }
 0x1d4   :  { %2662 = vpow2.f32 %v1428_v4 }
 0x1d5   :  { %v1361_v7 = vpop.xlane.xlu0 %1360 }
 0x1d6   :  { %v1405_v63 = vsub.f32 %v3577_v9, %v1361_v7  ;;  %v1981_v9 = vld [vmem:[%s4002_s5] sm:$0xff] }
 0x1d8   :  { %v1422_v10 = vmul.f32 1.442695, %v1405_v63  ;;  %v1373_v0 = vpop.xlane.xlu2 %1372 }
 0x1d9   :  { %v1409_v55 = vsub.f32 %v3588_v23, %v1373_v0  ;;  %v544_v23 = vmul.f32 %v3672_v8, %v316_v11 }
 0x1da   :  { %2664 = vpow2.f32 %v1422_v10  ;;  %v3712_v24 = vpop.eup %2662 }
 0x1db   :  { %2628 = vmatmul.msk.f32.vlgmr.msrb.gmra.mxu3 %vm1355_vm1, %v3712_v24  ;;  %v1430_v6 = vmul.f32 1.442695, %v1409_v55 }
 0x1dc   :  { %1789 = vmatpush.msrb.mxu3 %v562_v35  ;;  %v541_v35 = vmul.f32 %v3692_v58, %v316_v11 }
 0x1de   :  { %1790 = vmatpush.msrb.mxu3 %v561_v60  ;;  %v539_v60 = vmul.f32 %v3741_v44, %v316_v11 }
 0x1e0   :  { %v3703_v29 = vpop.f32.mrf.mxu3  ;;  %v2665_v21 = vpop.eup %2664  ;;  %1791 = vmatpush.msrb.mxu3 %v560_v28 }
 0x1e1   :  { %v1389_v12 = vsel %vm1355_vm1, %v3703_v29, -inf  ;;  %2609 = vmatmul.msk.f32.gmra.mxu0 %vm1355_vm1, %v2665_v21  ;;  %2625 = vmatmul.msk.f32.vlgmr.msrb.gmra.mxu2 %vm1355_vm1, %v2665_v21 }
 0x1e2   :  { %1390 = vmax.xlane.f32.xlu2 %v1389_v12  ;;  %1709 = vmatpush.msrb.mxu2 %v530_v42  ;;  %v546_v12 = vmul.f32 %v3656_v18, %v316_v11 }
 0x1e3   :  { %1792 = vmatpush.msrb.mxu3 %v559_v45 }
 0x1e4   :  { %1710 = vmatpush.msrb.mxu2 %v529_v39 }
 0x1e5   :  { %1793 = vmatpush.msrb.mxu3 %v558_v27 }
 0x1e6   :  { %1711 = vmatpush.msrb.mxu2 %v528_v57  ;;  %v1376_v45 = vpop.xlane.xlu0 %1375 }
 0x1e7   :  { %1794 = vmatpush.msrb.mxu3 %v557_v36 }
 0x1e8   :  { %1712 = vmatpush.msrb.mxu2 %v527_v33  ;;  %v1410_v33 = vsub.f32 %v3605_v59, %v1376_v45 }
 0x1e9   :  { %1795 = vmatpush.msrb.mxu3 %v556_v30  ;;  %v334_v30 = vadd.f32 %v3579_v31, %v3405_v3 }
 0x1ea   :  { %1399 = vmax.xlane.f32.xlu2 %v1398_v20  ;;  %1713 = vmatpush.msrb.mxu2 %v526_v49  ;;  %v540_v20 = vmul.f32 %v3698_v5, %v316_v11  ;;  %v319_v49 = vadd.f32 %v3477_v17, %v3405_v3 }
 0x1eb   :  { %1984 = vperm.xlu1 %2657, %v1981_v9   ;;  %1796 = vmatpush.msrb.mxu3 %v555_v1  ;;  %v594_v17 = vmul.f32 %v3656_v18, %v334_v30 }
 0x1ec   :  { %1714 = vmatpush.msrb.mxu2 %v525_v40  ;;  %v1432_v40 = vmul.f32 1.442695, %v1410_v33  ;;  %v554_v59 = vmul.f32 %v3656_v18, %v319_v49  ;;  %v553_v31 = vmul.f32 %v3666_v16, %v319_v49  ;;  %v552_v0 = vmul.f32 %v3672_v8, %v319_v49 }
 0x1ed   :  { %v551_v55 = vmul.f32 %v3680_v53, %v319_v49 }
 0x1ee   :  { %1715 = vmatpush.msrb.mxu2 %v524_v43 }
 0x1f0   :  { %1716 = vmatpush.msrb.mxu2 %v523_v51  ;;  %v1382_v7 = vpop.xlane.xlu2 %1381 }
 0x1f1   :  { %v1412_v63 = vsub.f32 %v3618_v13, %v1382_v7  ;;  %v325_v13 = vadd.f32 %v3535_v15, %v3405_v3  ;;  %v590_v7 = vmul.f32 %v3686_v46, %v334_v30 }
 0x1f3   :  { %v1436_v10 = vmul.f32 1.442695, %v1412_v63  ;;  %v570_v9 = vmul.f32 %v3656_v18, %v325_v13  ;;  %v569_v42 = vmul.f32 %v3666_v16, %v325_v13  ;;  %v568_v39 = vmul.f32 %v3672_v8, %v325_v13 }
 0x1f4   :  { %v567_v27 = vmul.f32 %v3680_v53, %v325_v13  ;;  %v566_v36 = vmul.f32 %v3686_v46, %v325_v13  ;;  %v564_v1 = vmul.f32 %v3698_v5, %v325_v13  ;;  %v589_v63 = vmul.f32 %v3692_v58, %v334_v30 }
 0x1f5   :  { %v1364_v52 = vpop.xlane.xlu1 %1363 }
 0x1f6   :  { %v1406_v61 = vsub.f32 %v3616_v26, %v1364_v52  ;;  %v545_v26 = vmul.f32 %v3666_v16, %v316_v11  ;;  %v563_v52 = vmul.f32 %v3741_v44, %v325_v13 }
 0x1f8   :  { %v1424_v34 = vmul.f32 1.442695, %v1406_v61  ;;  %v593_v61 = vmul.f32 %v3666_v16, %v334_v30 }
 0x1f9   :  { %v1385_v51 = vpop.xlane.xlu0 %1384 }
 0x1fa   :  { %2666 = vpow2.f32 %v1424_v34  ;;  %v592_v34 = vmul.f32 %v3672_v8, %v334_v30 }
 0x1fb   :  { %2668 = vpow2.f32 %v1430_v6  ;;  %v591_v6 = vmul.f32 %v3680_v53, %v334_v30 }
 0x1fc   :  { %2670 = vpow2.f32 %v1436_v10  ;;  %v547_v10 = vmul.f32 %v3741_v44, %v319_v49 }
 0x200   :  { %v3746_v48 = vpop.f32.mrf.mxu3  ;;  %v2667_v4 = vpop.eup %2666 }
 0x201   :  { %v1401_v56 = vsel %vm1355_vm1, %v3746_v48, -inf  ;;  %2610 = vmatmul.msk.f32.gmra.mxu0 %vm1355_vm1, %v2667_v4  ;;  %2626 = vmatmul.msk.f32.vlgmr.msra.gmra.mxu1 %vm1355_vm1, %v2667_v4  ;;  %v3761_v19 = vpop.eup %2668 }
 0x202   :  { %1402 = vmax.xlane.f32.xlu0 %v1401_v56  ;;  %1749 = vmatpush.msra.mxu1 %v546_v12  ;;  %v3772_v21 = vpop.eup %2670  ;;  %v1413_v56 = vsub.f32 %v3628_v14, %v1385_v51  ;;  %v550_v14 = vmul.f32 %v3686_v46, %v319_v49  ;;  %v549_v12 = vmul.f32 %v3692_v58, %v319_v49 }
 0x204   :  { %1750 = vmatpush.msra.mxu1 %v545_v26  ;;  %v1438_v11 = vmul.f32 1.442695, %v1413_v56  ;;  %v328_v26 = vadd.f32 %v3556_v38, %v3405_v3 }
 0x206   :  { %1751 = vmatpush.msra.mxu1 %v544_v23  ;;  %v588_v23 = vmul.f32 %v3698_v5, %v334_v30  ;;  %v572_v33 = vmul.f32 %v3698_v5, %v328_v26 }
 0x208   :  { %1752 = vmatpush.msra.mxu1 %v543_v2 }
 0x209   :  { %2629 = vmatmul.msk.f32.vlgmr.msrb.gmra.mxu1 %vm1355_vm1, %v3761_v19 }
 0x20a   :  { %1753 = vmatpush.msra.mxu1 %v542_v32  ;;  %v578_v32 = vmul.f32 %v3656_v18, %v328_v26 }
 0x20c   :  { %1754 = vmatpush.msra.mxu1 %v541_v35  ;;  %v587_v35 = vmul.f32 %v3741_v44, %v334_v30 }
 0x20e   :  { %1755 = vmatpush.msra.mxu1 %v540_v20  ;;  %v577_v20 = vmul.f32 %v3666_v16, %v328_v26 }
 0x210   :  { %1756 = vmatpush.msra.mxu1 %v539_v60  ;;  %v1394_v2 = vpop.xlane.xlu0 %1393 }
 0x211   :  { %2632 = vmatmul.msk.f32.vlgmr.msra.gmra.mxu1 %vm1355_vm1, %v3772_v21 }
 0x212   :  { %1809 = vmatpush.msrb.mxu1 %v570_v9 }
 0x214   :  { %1810 = vmatpush.msrb.mxu1 %v569_v42  ;;  %v576_v42 = vmul.f32 %v3672_v8, %v328_v26 }
 0x215   :  { %v1367_v28 = vpop.xlane.xlu1 %1366 }
 0x216   :  { %v1407_v15 = vsub.f32 %v3634_v41, %v1367_v28  ;;  %1811 = vmatpush.msrb.mxu1 %v568_v39  ;;  %v565_v41 = vmul.f32 %v3692_v58, %v325_v13  ;;  %v1416_v13 = vsub.f32 %v3638_v47, %v1394_v2  ;;  %v574_v47 = vmul.f32 %v3686_v46, %v328_v26 }
 0x217   :  { %v331_v39 = vadd.f32 %v3566_v25, %v3405_v3  ;;  %v571_v25 = vmul.f32 %v3741_v44, %v328_v26 }
 0x218   :  { %v1426_v57 = vmul.f32 1.442695, %v1407_v15  ;;  %1812 = vmatpush.msrb.mxu1 %v567_v27  ;;  %v1444_v15 = vmul.f32 1.442695, %v1416_v13  ;;  %v337_v27 = vadd.f32 %v3594_v62, %v3405_v3 }
 0x219   :  { %v585_v30 = vmul.f32 %v3666_v16, %v331_v39  ;;  %v584_v62 = vmul.f32 %v3672_v8, %v331_v39  ;;  %v583_v51 = vmul.f32 %v3680_v53, %v331_v39 }
 0x21a   :  { %2672 = vpow2.f32 %v1426_v57  ;;  %1813 = vmatpush.msrb.mxu1 %v566_v36  ;;  %v602_v3 = vmul.f32 %v3656_v18, %v337_v27 }
 0x21b   :  { %2674 = vpow2.f32 %v1432_v40  ;;  %v601_v40 = vmul.f32 %v3666_v16, %v337_v27  ;;  %v581_v16 = vmul.f32 %v3692_v58, %v331_v39 }
 0x21c   :  { %1814 = vmatpush.msrb.mxu1 %v565_v41  ;;  %2676 = vpow2.f32 %v1438_v11  ;;  %v586_v41 = vmul.f32 %v3656_v18, %v331_v39  ;;  %v600_v18 = vmul.f32 %v3672_v8, %v337_v27  ;;  %v580_v8 = vmul.f32 %v3698_v5, %v331_v39 }
 0x21e   :  { %1815 = vmatpush.msrb.mxu1 %v564_v1 }
 0x220   :  { %v2673_v43 = vpop.eup %2672  ;;  %1816 = vmatpush.msrb.mxu1 %v563_v52 }
 0x221   :  { %2611 = vmatmul.msk.f32.gmra.mxu0 %vm1355_vm1, %v2673_v43  ;;  %2627 = vmatmul.msk.f32.vlgmr.msra.gmra.mxu2 %vm1355_vm1, %v2673_v43  ;;  %v2675_v4 = vpop.eup %2674 }
 0x222   :  { %1769 = vmatpush.msra.mxu2 %v554_v59  ;;  %1869 = vmatpush.msra.mxu1 %v594_v17  ;;  %v3816_v38 = vpop.eup %2676  ;;  %v582_v17 = vmul.f32 %v3686_v46, %v331_v39 }
 0x224   :  { %1770 = vmatpush.msra.mxu2 %v553_v31  ;;  %1870 = vmatpush.msra.mxu1 %v593_v61  ;;  %v599_v31 = vmul.f32 %v3680_v53, %v337_v27  ;;  %v597_v61 = vmul.f32 %v3692_v58, %v337_v27 }
 0x226   :  { %1771 = vmatpush.msra.mxu2 %v552_v0  ;;  %1871 = vmatpush.msra.mxu1 %v592_v34  ;;  %v596_v0 = vmul.f32 %v3698_v5, %v337_v27 }
 0x228   :  { %1772 = vmatpush.msra.mxu2 %v551_v55  ;;  %1872 = vmatpush.msra.mxu1 %v591_v6 }
 0x229   :  { %2612 = vmatmul.msk.f32.gmra.mxu0 %vm1355_vm1, %v3712_v24  ;;  %2630 = vmatmul.msk.f32.vlgmr.msrb.gmra.mxu2 %vm1355_vm1, %v2675_v4  ;;  %v548_v24 = vmul.f32 %v3698_v5, %v319_v49 }
 0x22a   :  { %1773 = vmatpush.msra.mxu2 %v550_v14  ;;  %1873 = vmatpush.msra.mxu1 %v590_v7 }
 0x22c   :  { %1774 = vmatpush.msra.mxu2 %v549_v12  ;;  %1874 = vmatpush.msra.mxu1 %v589_v63 }
 0x22e   :  { %1775 = vmatpush.msra.mxu2 %v548_v24  ;;  %1875 = vmatpush.msra.mxu1 %v588_v23 }
 0x230   :  { %1776 = vmatpush.msra.mxu2 %v547_v10  ;;  %1876 = vmatpush.msra.mxu1 %v587_v35 }
 0x231   :  { %2613 = vmatmul.msk.f32.gmra.mxu0 %vm1355_vm1, %v3761_v19  ;;  %2633 = vmatmul.msk.f32.vlgmr.msra.gmra.mxu2 %vm1355_vm1, %v3816_v38  ;;  %v575_v19 = vmul.f32 %v3680_v53, %v328_v26  ;;  %v579_v53 = vmul.f32 %v3741_v44, %v331_v39 }
 0x232   :  { %1829 = vmatpush.msrb.mxu2 %v578_v32 }
 0x234   :  { %1830 = vmatpush.msrb.mxu2 %v577_v20 }
 0x235   :  { %v1379_v60 = vpop.xlane.xlu1 %1378 }
 0x236   :  { %v1411_v9 = vsub.f32 %v3642_v50, %v1379_v60  ;;  %1831 = vmatpush.msrb.mxu2 %v576_v42  ;;  %v573_v50 = vmul.f32 %v3692_v58, %v328_v26 }
 0x238   :  { %v1434_v28 = vmul.f32 1.442695, %v1411_v9  ;;  %1832 = vmatpush.msrb.mxu2 %v575_v19 }
 0x239   :  { %2614 = vmatmul.msk.f32.gmra.mxu0 %vm1355_vm1, %v2675_v4 }
 0x23a   :  { %2678 = vpow2.f32 %v1434_v28  ;;  %1833 = vmatpush.msrb.mxu2 %v574_v47 }
 0x23b   :  { %2680 = vpow2.f32 %v1444_v15 }
 0x23c   :  { %1834 = vmatpush.msrb.mxu2 %v573_v50 }
 0x23d   :  { %v1388_v45 = vpop.xlane.xlu1 %1387 }
 0x23e   :  { %v1414_v57 = vsub.f32 %v3647_v37, %v1388_v45  ;;  %1835 = vmatpush.msrb.mxu2 %v572_v33 }
 0x23f   :  { %v1517_v56 = vpop.f32.mrf.mxu0 }
 0x240   :  { %v2679_v36 = vpop.eup %2678  ;;  %v1440_v49 = vmul.f32 1.442695, %v1414_v57  ;;  %1836 = vmatpush.msrb.mxu2 %v571_v25  ;;  %v1565_v55 = vmax.f32 %v1517_v56, 1e-30  ;;  %v1598_v24 = vpop.f32.mrf.mxu1 }
 0x241   :  { %2631 = vmatmul.msk.f32.vlgmr.msra.gmra.mxu3 %vm1355_vm1, %v2679_v36  ;;  %v3838_v37 = vpop.eup %2680  ;;  %2615 = vmatmul.msk.f32.gmra.mxu0 %vm1355_vm1, %v2679_v36 }
 0x242   :  { %2682 = vpow2.f32 %v1440_v49  ;;  %1849 = vmatpush.msra.mxu3 %v586_v41  ;;  %2636 = vmatmul.msk.f32.vlgmr.msrb.gmra.mxu2 %vm1355_vm1, %v3838_v37 }
 0x243   :  { %1889 = vmatpush.msra.mxu2 %v602_v3 }
 0x244   :  { %1850 = vmatpush.msra.mxu3 %v585_v30 }
 0x245   :  { %v1397_v1 = vpop.xlane.xlu1 %1396  ;;  %1890 = vmatpush.msra.mxu2 %v601_v40 }
 0x246   :  { %1851 = vmatpush.msra.mxu3 %v584_v62  ;;  %v1417_v43 = vsub.f32 %v3661_v22, %v1397_v1  ;;  %v598_v22 = vmul.f32 %v3686_v46, %v337_v27  ;;  %v595_v46 = vmul.f32 %v3741_v44, %v337_v27 }
 0x247   :  { %1891 = vmatpush.msra.mxu2 %v600_v18 }
 0x248   :  { %v2683_v59 = vpop.eup %2682  ;;  %v1446_v52 = vmul.f32 1.442695, %v1417_v43  ;;  %1852 = vmatpush.msra.mxu3 %v583_v51 }
 0x249   :  { %2634 = vmatmul.msk.f32.vlgmr.msrb.gmra.mxu3 %vm1355_vm1, %v2683_v59  ;;  %1892 = vmatpush.msra.mxu2 %v599_v31 }
 0x24a   :  { %2684 = vpow2.f32 %v1446_v52  ;;  %1853 = vmatpush.msra.mxu3 %v582_v17  ;;  %2616 = vmatmul.msk.f32.gmra.mxu0 %vm1355_vm1, %v3772_v21 }
 0x24b   :  { %1893 = vmatpush.msra.mxu2 %v598_v22  ;;  %2686 = vrcp.f32 %v1565_v55 }
 0x24c   :  { %1854 = vmatpush.msra.mxu3 %v581_v16 }
 0x24d   :  { %1894 = vmatpush.msra.mxu2 %v597_v61 }
 0x24e   :  { %1855 = vmatpush.msra.mxu3 %v580_v8 }
 0x24f   :  { %1895 = vmatpush.msra.mxu2 %v596_v0 }
 0x250   :  { %v2685_v34 = vpop.eup %2684  ;;  %1856 = vmatpush.msra.mxu3 %v579_v53 }
 0x251   :  { %2637 = vmatmul.msk.f32.vlgmr.msra.gmra.mxu3 %vm1355_vm1, %v2685_v34  ;;  %1896 = vmatpush.msra.mxu2 %v595_v46  ;;  %v2687_v6 = vpop.eup %2686 }
 0x252   :  { %2617 = vmatmul.msk.f32.gmra.mxu0 %vm1355_vm1, %v3816_v38  ;;  %v1917_v7 = vmul.f32 %v2687_v6, %v1565_v55 }
 0x254   :  { %v1933_v44 = vsub.f32 2.0, %v1917_v7 }
 0x255   :  { %v1391_v11 = vpop.xlane.xlu2 %1390 }
 0x256   :  { %v1415_v21 = vsub.f32 %v3703_v29, %v1391_v11  ;;  %v1949_v26 = vmul.f32 %v2687_v6, %v1933_v44 }
 0x258   :  { %v1442_v58 = vmul.f32 1.442695, %v1415_v21  ;;  %v1965_v2 = vmul.f32 %v1949_v26, %v1598_v24 }
 0x25a   :  { %2688 = vpow2.f32 %v1442_v58  ;;  %2618 = vmatmul.msk.f32.gmra.mxu0 %vm1355_vm1, %v2683_v59 }
 0x25d   :  { %v1400_v5 = vpop.xlane.xlu2 %1399  ;;  %v3870_v23 = vpop.permute.xlu1 %1984 }
 0x25e   :  { %v1418_v4 = vsub.f32 %v3710_v54, %v1400_v5  ;;  %v1520_v63 = vpop.f32.mrf.mxu0  ;;  %v3873_v10 = vmul.f32 %v3870_v23, %v1965_v2 }
 0x25f   :  { %v1566_v54 = vmax.f32 %v1520_v63, 1e-30 }
 0x260   :  { %v2689_v14 = vpop.eup %2688  ;;  %v1448_v12 = vmul.f32 1.442695, %v1418_v4  ;;  %v2004_v32 = vsel %vm2003_vm2, %v3873_v10, 0.0 }
 0x261   :  { %2635 = vmatmul.msk.f32.vlgmr.msrb.gmra.mxu1 %vm1355_vm1, %v2689_v14  ;;  %v2005_v60 = vrot.slane %v2004_v32, 4 }
 0x262   :  { %2690 = vpow2.f32 %v1448_v12  ;;  %2619 = vmatmul.msk.f32.gmra.mxu0 %vm1355_vm1, %v2689_v14 }
 0x263   :  { %2692 = vrcp.f32 %v1566_v54  ;;  %v2006_v19 = vadd.f32 %v2005_v60, %v2004_v32  ;;  %v1678_v32 = vpop.f32.mrf.mxu3 }
 0x264   :  { %v1618_v15 = vpop.f32.mrf.mxu2 }
 0x265   :  { %v2007_v45 = vrot.slane %v2006_v19, 2 }
 0x267   :  { %v2008_v27 = vadd.f32 %v2007_v45, %v2006_v19 }
 0x268   :  { %v2691_v29 = vpop.eup %2690 }
 0x269   :  { %2638 = vmatmul.msk.f32.vlgmr.msra.gmra.mxu1 %vm1355_vm1, %v2691_v29  ;;  %v2693_v38 = vpop.eup %2692  ;;  %v2009_v49 = vrot.slane %v2008_v27, 1 }
 0x26a   :  { %2620 = vmatmul.msk.f32.gmra.mxu0 %vm1355_vm1, %v3838_v37  ;;  %v1918_v20 = vmul.f32 %v2693_v38, %v1566_v54 }
 0x26b   :  { %v2010_v37 = vadd.f32 %v2009_v49, %v2008_v27 }
 0x26c   :  { %v1934_v42 = vsub.f32 2.0, %v1918_v20 }
 0x26e   :  { %v1950_v28 = vmul.f32 %v2693_v38, %v1934_v42  ;;  %v2132_v38 = vrot.slane %v3873_v10, 4 }
 0x270   :  { %v1966_v47 = vmul.f32 %v1950_v28, %v1618_v15 }
 0x272   :  { %2621 = vmatmul.msk.f32.gmra.mxu0 %vm1355_vm1, %v2685_v34  ;;  %v3882_v39 = vmul.f32 %v3870_v23, %v1966_v47 }
 0x274   :  { %v2011_v57 = vsel %vm2003_vm2, %v3882_v39, 0.0  ;;  %v2133_v28 = vrot.slane %v3882_v39, 4 }
 0x275   :  { %v1403_v35 = vpop.xlane.xlu0 %1402 }
 0x276   :  { %v1419_v13 = vsub.f32 %v3746_v48, %v1403_v35  ;;  %v2012_v48 = vrot.slane %v2011_v57, 4  ;;  %v2171_v10 = vsel %vm2003_vm2, %v2133_v28, 0.0 }
 0x278   :  { %v1450_v9 = vmul.f32 1.442695, %v1419_v13  ;;  %v2013_v33 = vadd.f32 %v2012_v48, %v2011_v57 }
 0x27a   :  { %2694 = vpow2.f32 %v1450_v9  ;;  %2622 = vmatmul.msk.f32.gmra.mxu0 %vm1355_vm1, %v2691_v29  ;;  %v2014_v36 = vrot.slane %v2013_v33, 2 }
 0x27c   :  { %v2015_v41 = vadd.f32 %v2014_v36, %v2013_v33 }
 0x27e   :  { %v2016_v25 = vrot.slane %v2015_v41, 1  ;;  %v1523_v30 = vpop.f32.mrf.mxu0  ;;  %v1638_v59 = vpop.f32.mrf.mxu1 }
 0x27f   :  { %v1567_v62 = vmax.f32 %v1523_v30, 1e-30 }
 0x280   :  { %v2695_v50 = vpop.eup %2694  ;;  %v2017_v3 = vadd.f32 %v2016_v25, %v2015_v41 }
 0x281   :  { %2639 = vmatmul.msk.f32.vlgmr.msra.gmra.mxu2 %vm1355_vm1, %v2695_v50  ;;  %2696 = vrcp.f32 %v1567_v62 }
 0x282   :  { %2623 = vmatmul.msk.f32.gmra.mxu0 %vm1355_vm1, %v2695_v50  ;;  %v2293_v40 = vsel %vm2292_vm3, %v2017_v3, %v2010_v37  ;;  %v2164_v50 = vsel %vm2003_vm2, %v2132_v38, 0.0 }
 0x283   :  { %v2165_v36 = vrot.slane %v2164_v50, 4 }
 0x286   :  { %v1698_v39 = vpop.f32.mrf.mxu1 }
 0x287   :  { %v2697_v1 = vpop.eup %2696 }
 0x288   :  { %v1919_v43 = vmul.f32 %v2697_v1, %v1567_v62  ;;  %v2172_v62 = vrot.slane %v2171_v10, 4 }
 0x28a   :  { %v1935_v51 = vsub.f32 2.0, %v1919_v43 }
 0x28c   :  { %v1951_v18 = vmul.f32 %v2697_v1, %v1935_v51 }
 0x28e   :  { %v1967_v52 = vmul.f32 %v1951_v18, %v1638_v59 }
 0x290   :  { %v3891_v17 = vmul.f32 %v3870_v23, %v1967_v52 }
 0x292   :  { %v2018_v31 = vsel %vm2003_vm2, %v3891_v17, 0.0  ;;  %v2134_v49 = vrot.slane %v3891_v17, 4 }
 0x293   :  { %v2019_v16 = vrot.slane %v2018_v31, 4 }
 0x295   :  { %v2020_v22 = vadd.f32 %v2019_v16, %v2018_v31  ;;  %v2178_v31 = vsel %vm2003_vm2, %v2134_v49, 0.0 }
 0x297   :  { %v2021_v8 = vrot.slane %v2020_v22, 2 }
 0x299   :  { %v2022_v56 = vadd.f32 %v2021_v8, %v2020_v22  ;;  %v2166_v22 = vadd.f32 %v2165_v36, %v2164_v50 }
 0x29b   :  { %v2023_v53 = vrot.slane %v2022_v56, 1 }
 0x29d   :  { %v2024_v34 = vadd.f32 %v2023_v53, %v2022_v56  ;;  %v2173_v53 = vadd.f32 %v2172_v62, %v2171_v10 }
 0x29e   :  { %v1526_v61 = vpop.f32.mrf.mxu0 }
 0x29f   :  { %v1568_v0 = vmax.f32 %v1526_v61, 1e-30  ;;  %v2295_v55 = vsel %vm2294_vm4, %v2024_v34, %v2293_v40 }
 0x2a1   :  { %2698 = vrcp.f32 %v1568_v0 }
 0x2a4   :  { %v1658_v4 = vpop.f32.mrf.mxu2 }
 0x2a6   :  { %v1529_v46 = vpop.f32.mrf.mxu0 }
 0x2a7   :  { %v2699_v11 = vpop.eup %2698  ;;  %v1569_v21 = vmax.f32 %v1529_v46, 1e-30  ;;  %v2179_v46 = vrot.slane %v2178_v31, 4 }
 0x2a8   :  { %v1920_v58 = vmul.f32 %v2699_v11, %v1568_v0 }
 0x2a9   :  { %2700 = vrcp.f32 %v1569_v21 }
 0x2aa   :  { %v1936_v6 = vsub.f32 2.0, %v1920_v58 }
 0x2ac   :  { %v1952_v5 = vmul.f32 %v2699_v11, %v1936_v6  ;;  %v1718_v6 = vpop.f32.mrf.mxu2 }
 0x2ae   :  { %v1968_v14 = vmul.f32 %v1952_v5, %v1658_v4  ;;  %v1532_v7 = vpop.f32.mrf.mxu0 }
 0x2af   :  { %v2701_v12 = vpop.eup %2700  ;;  %v1570_v44 = vmax.f32 %v1532_v7, 1e-30 }
 0x2b0   :  { %v1990_v29 = vmul.f32 %v3870_v23, %v1968_v14  ;;  %v1921_v26 = vmul.f32 %v2701_v12, %v1569_v21 }
 0x2b1   :  { %2702 = vrcp.f32 %v1570_v44 }
 0x2b2   :  { %v2025_v63 = vsel %vm2003_vm2, %v1990_v29, 0.0  ;;  %v1937_v24 = vsub.f32 2.0, %v1921_v26  ;;  %v2135_v25 = vrot.slane %v1990_v29, 4  ;;  %v2167_v26 = vrot.slane %v2166_v22, 2 }
 0x2b3   :  { %v2026_v54 = vrot.slane %v2025_v63, 4 }
 0x2b4   :  { %v1953_v2 = vmul.f32 %v2701_v12, %v1937_v24  ;;  %v2185_v17 = vsel %vm2003_vm2, %v2135_v25, 0.0 }
 0x2b5   :  { %v2027_v35 = vadd.f32 %v2026_v54, %v2025_v63  ;;  %v2186_v58 = vrot.slane %v2185_v17, 4  ;;  %v2174_v54 = vrot.slane %v2173_v53, 2 }
 0x2b6   :  { %v1969_v13 = vmul.f32 %v1953_v2, %v1678_v32  ;;  %v1535_v20 = vpop.f32.mrf.mxu0  ;;  %v2180_v2 = vadd.f32 %v2179_v46, %v2178_v31 }
 0x2b7   :  { %v2703_v60 = vpop.eup %2702  ;;  %v2028_v9 = vrot.slane %v2027_v35, 2  ;;  %v1571_v42 = vmax.f32 %v1535_v20, 1e-30  ;;  %v2187_v38 = vadd.f32 %v2186_v58, %v2185_v17  ;;  %v2175_v50 = vadd.f32 %v2174_v54, %v2173_v53 }
 0x2b8   :  { %v1991_v15 = vmul.f32 %v3870_v23, %v1969_v13  ;;  %v1922_v19 = vmul.f32 %v2703_v60, %v1570_v44 }
 0x2b9   :  { %v2029_v47 = vadd.f32 %v2028_v9, %v2027_v35  ;;  %2704 = vrcp.f32 %v1571_v42  ;;  %v2188_v36 = vrot.slane %v2187_v38, 2 }
 0x2ba   :  { %v2032_v45 = vsel %vm2003_vm2, %v1991_v15, 0.0  ;;  %v1938_v57 = vsub.f32 2.0, %v1922_v19  ;;  %v2136_v1 = vrot.slane %v1991_v15, 4 }
 0x2bb   :  { %v2030_v48 = vrot.slane %v2029_v47, 1  ;;  %v2033_v27 = vrot.slane %v2032_v45, 4 }
 0x2bc   :  { %v1954_v33 = vmul.f32 %v2703_v60, %v1938_v57  ;;  %v2192_v34 = vsel %vm2003_vm2, %v2136_v1, 0.0 }
 0x2bd   :  { %v2031_v41 = vadd.f32 %v2030_v48, %v2029_v47  ;;  %v2034_v30 = vadd.f32 %v2033_v27, %v2032_v45  ;;  %v2193_v14 = vrot.slane %v2192_v34, 4  ;;  %v2181_v45 = vrot.slane %v2180_v2, 2 }
 0x2be   :  { %v1970_v37 = vmul.f32 %v1954_v33, %v1698_v39  ;;  %v1538_v43 = vpop.f32.mrf.mxu0  ;;  %v2168_v48 = vadd.f32 %v2167_v26, %v2166_v22 }
 0x2bf   :  { %v2705_v3 = vpop.eup %2704  ;;  %v2035_v40 = vrot.slane %v2034_v30, 2  ;;  %v2297_v51 = vsel %vm2296_vm5, %v2031_v41, %v2295_v55  ;;  %v1572_v52 = vmax.f32 %v1538_v43, 1e-30  ;;  %v2194_v60 = vadd.f32 %v2193_v14, %v2192_v34 }
 0x2c0   :  { %v1992_v18 = vmul.f32 %v3870_v23, %v1970_v37  ;;  %v1923_v59 = vmul.f32 %v2705_v3, %v1571_v42  ;;  %v2182_v1 = vadd.f32 %v2181_v45, %v2180_v2 }
 0x2c1   :  { %v2036_v16 = vadd.f32 %v2035_v40, %v2034_v30  ;;  %2706 = vrcp.f32 %v1572_v52  ;;  %v2195_v49 = vrot.slane %v2194_v60, 2 }
 0x2c2   :  { %v2039_v8 = vsel %vm2003_vm2, %v1992_v18, 0.0  ;;  %v2137_v56 = vrot.slane %v1992_v18, 4  ;;  %v1939_v61 = vsub.f32 2.0, %v1923_v59  ;;  %v2176_v59 = vrot.slane %v2175_v50, 1 }
 0x2c3   :  { %v2037_v0 = vrot.slane %v2036_v16, 1  ;;  %v2040_v55 = vrot.slane %v2039_v8, 4  ;;  %v2196_v22 = vadd.f32 %v2195_v49, %v2194_v60  ;;  %v2183_v34 = vrot.slane %v2182_v1, 1 }
 0x2c4   :  { %v2199_v11 = vsel %vm2003_vm2, %v2137_v56, 0.0  ;;  %v1955_v21 = vmul.f32 %v2705_v3, %v1939_v61  ;;  %v1738_v39 = vpop.f32.mrf.mxu3 }
 0x2c5   :  { %v2041_v5 = vadd.f32 %v2040_v55, %v2039_v8  ;;  %v2038_v4 = vadd.f32 %v2037_v0, %v2036_v16  ;;  %v2200_v44 = vrot.slane %v2199_v11, 4  ;;  %v2189_v16 = vadd.f32 %v2188_v36, %v2187_v38 }
 0x2c6   :  { %v1971_v7 = vmul.f32 %v1955_v21, %v1718_v6 }
 0x2c7   :  { %v2042_v12 = vrot.slane %v2041_v5, 2  ;;  %v1541_v29 = vpop.f32.mrf.mxu0  ;;  %v2299_v63 = vsel %vm2298_vm6, %v2038_v4, %v2297_v51  ;;  %v2707_v24 = vpop.eup %2706  ;;  %v2201_v28 = vadd.f32 %v2200_v44, %v2199_v11  ;;  %v2169_v51 = vrot.slane %v2168_v48, 1 }
 0x2c8   :  { %v1993_v32 = vmul.f32 %v3870_v23, %v1971_v7  ;;  %v1573_v35 = vmax.f32 %v1541_v29, 1e-30  ;;  %v1924_v20 = vmul.f32 %v2707_v24, %v1572_v52  ;;  %v2190_v4 = vrot.slane %v2189_v16, 1 }
 0x2c9   :  { %v2043_v13 = vadd.f32 %v2042_v12, %v2041_v5  ;;  %v2202_v3 = vrot.slane %v2201_v28, 2  ;;  %v2170_v46 = vadd.f32 %v2169_v51, %v2168_v48  ;;  %v1758_v5 = vpop.f32.mrf.mxu1  ;;  %v2177_v44 = vadd.f32 %v2176_v59, %v2175_v50 }
 0x2ca   :  { %v2046_v9 = vsel %vm2003_vm2, %v1993_v32, 0.0  ;;  %v2138_v42 = vrot.slane %v1993_v32, 4  ;;  %2708 = vrcp.f32 %v1573_v35  ;;  %v1940_v19 = vsub.f32 2.0, %v1924_v20 }
 0x2cb   :  { %v2047_v15 = vrot.slane %v2046_v9, 4  ;;  %v2044_v47 = vrot.slane %v2043_v13, 1  ;;  %v2203_v0 = vadd.f32 %v2202_v3, %v2201_v28  ;;  %v2331_v45 = vsel %vm2292_vm3, %v2177_v44, %v2170_v46 }
 0x2cc   :  { %v2206_v57 = vsel %vm2003_vm2, %v2138_v42, 0.0  ;;  %v1956_v33 = vmul.f32 %v2707_v24, %v1940_v19  ;;  %v2191_v42 = vadd.f32 %v2190_v4, %v2189_v16 }
 0x2cd   :  { %v2048_v27 = vadd.f32 %v2047_v15, %v2046_v9  ;;  %v2207_v10 = vrot.slane %v2206_v57, 4  ;;  %v2045_v41 = vadd.f32 %v2044_v47, %v2043_v13  ;;  %v2204_v24 = vrot.slane %v2203_v0, 1 }
 0x2ce   :  { %v1972_v30 = vmul.f32 %v1956_v33, %v1738_v39  ;;  %v2184_v13 = vadd.f32 %v2183_v34, %v2182_v1  ;;  %v1778_v39 = vpop.f32.mrf.mxu2 }
 0x2cf   :  { %v2049_v25 = vrot.slane %v2048_v27, 2  ;;  %v1544_v37 = vpop.f32.mrf.mxu0  ;;  %v2208_v62 = vadd.f32 %v2207_v10, %v2206_v57  ;;  %v2301_v18 = vsel %vm2300_vm7, %v2045_v41, %v2299_v63  ;;  %v2197_v63 = vrot.slane %v2196_v22, 1 }
 0x2d0   :  { %v2709_v40 = vpop.eup %2708  ;;  %v1574_v43 = vmax.f32 %v1544_v37, 1e-30  ;;  %v1994_v52 = vmul.f32 %v3870_v23, %v1972_v30  ;;  %v2332_v49 = vsel %vm2294_vm4, %v2184_v13, %v2331_v45 }
 0x2d1   :  { %v1925_v31 = vmul.f32 %v2709_v40, %v1573_v35  ;;  %v2209_v17 = vrot.slane %v2208_v62, 2  ;;  %v2050_v8 = vadd.f32 %v2049_v25, %v2048_v27  ;;  %v2198_v50 = vadd.f32 %v2197_v63, %v2196_v22 }
 0x2d2   :  { %2710 = vrcp.f32 %v1574_v43  ;;  %v2053_v56 = vsel %vm2003_vm2, %v1994_v52, 0.0  ;;  %v2139_v61 = vrot.slane %v1994_v52, 4  ;;  %v2205_v27 = vadd.f32 %v2204_v24, %v2203_v0  ;;  %v1798_v0 = vpop.f32.mrf.mxu3 }
 0x2d3   :  { %v1941_v53 = vsub.f32 2.0, %v1925_v31  ;;  %v2054_v55 = vrot.slane %v2053_v56, 4  ;;  %v2051_v11 = vrot.slane %v2050_v8, 1  ;;  %v2210_v6 = vadd.f32 %v2209_v17, %v2208_v62 }
 0x2d4   :  { %v2213_v21 = vsel %vm2003_vm2, %v2139_v61, 0.0  ;;  %v2333_v25 = vsel %vm2296_vm5, %v2191_v42, %v2332_v49 }
 0x2d5   :  { %v1957_v58 = vmul.f32 %v2709_v40, %v1941_v53  ;;  %v2055_v14 = vadd.f32 %v2054_v55, %v2053_v56  ;;  %v2214_v7 = vrot.slane %v2213_v21, 4  ;;  %v2052_v12 = vadd.f32 %v2051_v11, %v2050_v8 }
 0x2d6   :  { %v2211_v9 = vrot.slane %v2210_v6, 1  ;;  %v2334_v40 = vsel %vm2298_vm6, %v2198_v50, %v2333_v25 }
 0x2d7   :  { %v1973_v29 = vmul.f32 %v1957_v58, %v1758_v5  ;;  %v1547_v26 = vpop.f32.mrf.mxu0  ;;  %v2056_v2 = vrot.slane %v2055_v14, 2  ;;  %v2215_v32 = vadd.f32 %v2214_v7, %v2213_v21  ;;  %v2303_v38 = vsel %vm2302_vm8, %v2052_v12, %v2301_v18 }
 0x2d8   :  { %v2711_v54 = vpop.eup %2710  ;;  %v1575_v35 = vmax.f32 %v1547_v26, 1e-30  ;;  %v2212_v36 = vadd.f32 %v2211_v9, %v2210_v6  ;;  %v2335_v18 = vsel %vm2300_vm7, %v2205_v27, %v2334_v40  ;;  %v1838_v27 = vpop.f32.mrf.mxu2 }
 0x2d9   :  { %v3922_v20 = vmul.f32 %v3870_v23, %v1973_v29  ;;  %v1926_v60 = vmul.f32 %v2711_v54, %v1574_v43  ;;  %v2057_v28 = vadd.f32 %v2056_v2, %v2055_v14  ;;  %v2216_v15 = vrot.slane %v2215_v32, 2 }
 0x2da   :  { %2712 = vrcp.f32 %v1575_v35  ;;  %v2336_v31 = vsel %vm2302_vm8, %v2212_v36, %v2335_v18 }
 0x2db   :  { %v2060_v19 = vsel %vm2003_vm2, %v3922_v20, 0.0  ;;  %v1942_v47 = vsub.f32 2.0, %v1926_v60  ;;  %v2058_v57 = vrot.slane %v2057_v28, 1  ;;  %v2217_v10 = vadd.f32 %v2216_v15, %v2215_v32 }
 0x2dc   :  { %v2061_v48 = vrot.slane %v2060_v19, 4 }
 0x2dd   :  { %v1958_v33 = vmul.f32 %v2711_v54, %v1942_v47  ;;  %v2218_v41 = vrot.slane %v2217_v10, 1  ;;  %v2059_v30 = vadd.f32 %v2058_v57, %v2057_v28 }
 0x2de   :  { %v2062_v37 = vadd.f32 %v2061_v48, %v2060_v19  ;;  %v1818_v2 = vpop.f32.mrf.mxu1 }
 0x2df   :  { %v1974_v3 = vmul.f32 %v1958_v33, %v1778_v39  ;;  %v1550_v62 = vpop.f32.mrf.mxu0  ;;  %v2219_v51 = vadd.f32 %v2218_v41, %v2217_v10  ;;  %v3936_v17 = vsel %vm2304_vm9, %v2059_v30, %v2303_v38 }
 0x2e0   :  { %v2713_v1 = vpop.eup %2712  ;;  %v1576_v43 = vmax.f32 %v1550_v62, 1e-30  ;;  %v2063_v22 = vrot.slane %v2062_v37, 2 }
 0x2e1   :  { %v3932_v59 = vmul.f32 %v3870_v23, %v1974_v3  ;;  %v1927_v52 = vmul.f32 %v2713_v1, %v1575_v35  ;;  %v2337_v16 = vsel %vm2304_vm9, %v2219_v51, %v2336_v31 }
 0x2e2   :  { %2714 = vrcp.f32 %v1576_v43  ;;  %2345 = vrot.lane.b32.xlu2 %v2337_v16, %s2815_s6  ;;  %v2064_v55 = vadd.f32 %v2063_v22, %v2062_v37  ;;  %v1858_v16 = vpop.f32.mrf.mxu3 }
 0x2e3   :  { %v2067_v8 = vsel %vm2003_vm2, %v3932_v59, 0.0  ;;  %v1943_v56 = vsub.f32 2.0, %v1927_v52  ;;  %v2141_v40 = vrot.slane %v3932_v59, 4  ;;  %v2140_v52 = vrot.slane %v3922_v20, 4 }
 0x2e4   :  { %v2068_v61 = vrot.slane %v2067_v8, 4  ;;  %v2065_v7 = vrot.slane %v2064_v55, 1 }
 0x2e5   :  { %v1959_v53 = vmul.f32 %v2713_v1, %v1943_v56 }
 0x2e6   :  { %v2069_v34 = vadd.f32 %v2068_v61, %v2067_v8  ;;  %v2066_v32 = vadd.f32 %v2065_v7, %v2064_v55  ;;  %v2227_v61 = vsel %vm2003_vm2, %v2141_v40, 0.0 }
 0x2e7   :  { %v1975_v46 = vmul.f32 %v1959_v53, %v1798_v0  ;;  %v1553_v11 = vpop.f32.mrf.mxu0 }
 0x2e8   :  { %v2715_v21 = vpop.eup %2714  ;;  %v2070_v58 = vrot.slane %v2069_v34, 2  ;;  %v1577_v6 = vmax.f32 %v1553_v11, 1e-30 }
 0x2e9   :  { %v3943_v5 = vmul.f32 %v3870_v23, %v1975_v46  ;;  %v1928_v4 = vmul.f32 %v2715_v21, %v1576_v43 }
 0x2ea   :  { %v2071_v14 = vadd.f32 %v2070_v58, %v2069_v34  ;;  %2716 = vrcp.f32 %v1577_v6 }
 0x2eb   :  { %v2074_v12 = vsel %vm2003_vm2, %v3943_v5, 0.0  ;;  %v1944_v44 = vsub.f32 2.0, %v1928_v4  ;;  %v2142_v22 = vrot.slane %v3943_v5, 4  ;;  %v2228_v4 = vrot.slane %v2227_v61, 4 }
 0x2ec   :  { %v2072_v29 = vrot.slane %v2071_v14, 1  ;;  %v2075_v26 = vrot.slane %v2074_v12, 4 }
 0x2ed   :  { %v1960_v63 = vmul.f32 %v2715_v21, %v1944_v44  ;;  %v2220_v21 = vsel %vm2003_vm2, %v2140_v52, 0.0  ;;  %v2234_v5 = vsel %vm2003_vm2, %v2142_v22, 0.0 }
 0x2ee   :  { %v2073_v24 = vadd.f32 %v2072_v29, %v2071_v14  ;;  %v2076_v54 = vadd.f32 %v2075_v26, %v2074_v12  ;;  %v2360_v26 = vld [vmem:[#allocation5 + $0x38] sm:$0xff] }
 0x2ef   :  { %v1976_v35 = vmul.f32 %v1960_v63, %v1818_v2  ;;  %v1556_v38 = vpop.f32.mrf.mxu0  ;;  %v2359_v63 = vld [vmem:[#allocation5 + $0x30] sm:$0xff]  ;;  %2379 = vmatpush.msrb.mxu3 %v2360_v26 }
 0x2f0   :  { %v2717_v13 = vpop.eup %2716  ;;  %v2077_v60 = vrot.slane %v2076_v54, 2  ;;  %v1578_v9 = vmax.f32 %v1556_v38, 1e-30  ;;  %v2306_v15 = vsel %vm2292_vm3, %v2073_v24, %v2066_v32  ;;  %v2221_v32 = vrot.slane %v2220_v21, 4 }
 0x2f1   :  { %v1998_v42 = vmul.f32 %v3870_v23, %v1976_v35  ;;  %v1929_v28 = vmul.f32 %v2717_v13, %v1577_v6  ;;  %v2235_v35 = vrot.slane %v2234_v5, 4  ;;  %2380 = vmatpush.msrb.mxu3 %v2359_v63 }
 0x2f2   :  { %v2078_v19 = vadd.f32 %v2077_v60, %v2076_v54  ;;  %2718 = vrcp.f32 %v1578_v9  ;;  %v2358_v60 = vld [vmem:[#allocation5 + $0x28] sm:$0xff] }
 0x2f3   :  { %v2081_v47 = vsel %vm2003_vm2, %v1998_v42, 0.0  ;;  %v1945_v50 = vsub.f32 2.0, %v1929_v28  ;;  %v2143_v53 = vrot.slane %v1998_v42, 4  ;;  %v1878_v28 = vpop.f32.mrf.mxu1  ;;  %2381 = vmatpush.msrb.mxu3 %v2358_v60 }
 0x2f4   :  { %v2079_v45 = vrot.slane %v2078_v19, 1  ;;  %v2082_v57 = vrot.slane %v2081_v47, 4 }
 0x2f5   :  { %v1961_v48 = vmul.f32 %v2717_v13, %v1945_v50  ;;  %v2241_v7 = vsel %vm2003_vm2, %v2143_v53, 0.0 }
 0x2f6   :  { %v2080_v10 = vadd.f32 %v2079_v45, %v2078_v19  ;;  %v2083_v33 = vadd.f32 %v2082_v57, %v2081_v47  ;;  %v2242_v42 = vrot.slane %v2241_v7, 4  ;;  %v2357_v45 = vld [vmem:[#allocation5 + $0x20] sm:$0xff] }
 0x2f7   :  { %v1977_v36 = vmul.f32 %v1961_v48, %v1838_v27  ;;  %v1559_v49 = vpop.f32.mrf.mxu0  ;;  %2382 = vmatpush.msrb.mxu3 %v2357_v45 }
 0x2f8   :  { %v2719_v39 = vpop.eup %2718  ;;  %v2084_v41 = vrot.slane %v2083_v33, 2  ;;  %v1579_v25 = vmax.f32 %v1559_v49, 1e-30  ;;  %v2307_v3 = vsel %vm2294_vm4, %v2080_v10, %v2306_v15 }
 0x2f9   :  { %v1999_v30 = vmul.f32 %v3870_v23, %v1977_v36  ;;  %v1930_v37 = vmul.f32 %v2719_v39, %v1578_v9  ;;  %v2229_v9 = vadd.f32 %v2228_v4, %v2227_v61  ;;  %v2236_v36 = vadd.f32 %v2235_v35, %v2234_v5 }
 0x2fa   :  { %v2085_v62 = vadd.f32 %v2084_v41, %v2083_v33  ;;  %2720 = vrcp.f32 %v1579_v25  ;;  %v2222_v33 = vadd.f32 %v2221_v32, %v2220_v21  ;;  %v2356_v41 = vld [vmem:[#allocation5 + $0x18] sm:$0xff] }
 0x2fb   :  { %v2088_v1 = vsel %vm2003_vm2, %v1999_v30, 0.0  ;;  %v1946_v43 = vsub.f32 2.0, %v1930_v37  ;;  %v2144_v46 = vrot.slane %v1999_v30, 4  ;;  %v2243_v30 = vadd.f32 %v2242_v42, %v2241_v7  ;;  %2383 = vmatpush.msrb.mxu3 %v2356_v41 }
 0x2fc   :  { %v2086_v51 = vrot.slane %v2085_v62, 1  ;;  %v2089_v18 = vrot.slane %v2088_v1, 4 }
 0x2fd   :  { %v1962_v31 = vmul.f32 %v2719_v39, %v1946_v43  ;;  %v2248_v54 = vsel %vm2003_vm2, %v2144_v46, 0.0  ;;  %v2355_v43 = vld [vmem:[#allocation5 + $0x10] sm:$0xff]  ;;  %v2244_v61 = vrot.slane %v2243_v30, 2 }
 0x2fe   :  { %v2087_v8 = vadd.f32 %v2086_v51, %v2085_v62  ;;  %v2090_v56 = vadd.f32 %v2089_v18, %v2088_v1  ;;  %v2249_v47 = vrot.slane %v2248_v54, 4  ;;  %2384 = vmatpush.msrb.mxu3 %v2355_v43  ;;  %v2353_v43 = vld [vmem:[#allocation5] sm:$0xff] }
 0x2ff   :  { %v1978_v0 = vmul.f32 %v1962_v31, %v1858_v16  ;;  %v1562_v34 = vpop.f32.mrf.mxu0  ;;  %v2223_v31 = vrot.slane %v2222_v33, 2  ;;  %v2237_v16 = vrot.slane %v2236_v36, 2  ;;  %v2245_v7 = vadd.f32 %v2244_v61, %v2243_v30 }
 0x300   :  { %v2721_v55 = vpop.eup %2720  ;;  %v2091_v59 = vrot.slane %v2090_v56, 2  ;;  %v1580_v11 = vmax.f32 %v1562_v34, 1e-30  ;;  %v2308_v6 = vsel %vm2296_vm5, %v2087_v8, %v2307_v3  ;;  %v2250_v3 = vadd.f32 %v2249_v47, %v2248_v54 }
 0x301   :  { %v2000_v58 = vmul.f32 %v3870_v23, %v1978_v0  ;;  %v1931_v20 = vmul.f32 %v2721_v55, %v1579_v25  ;;  %v2230_v25 = vrot.slane %v2229_v9, 2  ;;  %v2224_v4 = vadd.f32 %v2223_v31, %v2222_v33 }
 0x302   :  { %v2092_v14 = vadd.f32 %v2091_v59, %v2090_v56  ;;  %2722 = vrcp.f32 %v1580_v11  ;;  %v2354_v56 = vld [vmem:[#allocation5 + $0x8] sm:$0xff]  ;;  %v2251_v46 = vrot.slane %v2250_v3, 2  ;;  %v2238_v5 = vadd.f32 %v2237_v16, %v2236_v36 }
 0x303   :  { %v2095_v12 = vsel %vm2003_vm2, %v2000_v58, 0.0  ;;  %v2145_v44 = vrot.slane %v2000_v58, 4  ;;  %v1947_v29 = vsub.f32 2.0, %v1931_v20  ;;  %v2231_v59 = vadd.f32 %v2230_v25, %v2229_v9  ;;  %2385 = vmatpush.msrb.mxu3 %v2354_v56 }
 0x304   :  { %v2093_v24 = vrot.slane %v2092_v14, 1  ;;  %v2096_v2 = vrot.slane %v2095_v12, 4  ;;  %v1898_v34 = vpop.f32.mrf.mxu2  ;;  %v2225_v35 = vrot.slane %v2224_v4, 1  ;;  %v2246_v42 = vrot.slane %v2245_v7, 1 }
 0x305   :  { %v2255_v38 = vsel %vm2003_vm2, %v2145_v44, 0.0  ;;  %v1963_v13 = vmul.f32 %v2721_v55, %v1947_v29  ;;  %v2232_v29 = vrot.slane %v2231_v59, 1  ;;  %2386 = vmatpush.msrb.mxu3 %v2353_v43 }
 0x306   :  { %v2097_v15 = vadd.f32 %v2096_v2, %v2095_v12  ;;  %v2094_v19 = vadd.f32 %v2093_v24, %v2092_v14  ;;  %v2256_v27 = vrot.slane %v2255_v38, 4  ;;  %v2252_v24 = vadd.f32 %v2251_v46, %v2250_v3 }
 0x307   :  { %v1979_v50 = vmul.f32 %v1963_v13, %v1878_v28  ;;  %v2247_v33 = vadd.f32 %v2246_v42, %v2245_v7 }
 0x308   :  { %v2723_v57 = vpop.eup %2722  ;;  %v2098_v48 = vrot.slane %v2097_v15, 2  ;;  %v2309_v10 = vsel %vm2298_vm6, %v2094_v19, %v2308_v6  ;;  %v2257_v51 = vadd.f32 %v2256_v27, %v2255_v38  ;;  %v2239_v38 = vrot.slane %v2238_v5, 1 }
 0x309   :  { %v2001_v49 = vmul.f32 %v3870_v23, %v1979_v50  ;;  %v1932_v39 = vmul.f32 %v2723_v57, %v1580_v11  ;;  %v2253_v19 = vrot.slane %v2252_v24, 1 }
 0x30a   :  { %v2099_v37 = vadd.f32 %v2098_v48, %v2097_v15  ;;  %v2258_v58 = vrot.slane %v2257_v51, 2  ;;  %v2233_v15 = vadd.f32 %v2232_v29, %v2231_v59  ;;  %v2240_v48 = vadd.f32 %v2239_v38, %v2238_v5 }
 0x30b   :  { %v2102_v62 = vsel %vm2003_vm2, %v2001_v49, 0.0  ;;  %v2146_v40 = vrot.slane %v2001_v49, 4  ;;  %v1948_v1 = vsub.f32 2.0, %v1932_v39  ;;  %v2254_v39 = vadd.f32 %v2253_v19, %v2252_v24 }
 0x30c   :  { %v2103_v18 = vrot.slane %v2102_v62, 4  ;;  %v2100_v52 = vrot.slane %v2099_v37, 1  ;;  %v2259_v2 = vadd.f32 %v2258_v58, %v2257_v51 }
 0x30d   :  { %v2262_v22 = vsel %vm2003_vm2, %v2146_v40, 0.0  ;;  %v1964_v8 = vmul.f32 %v2723_v57, %v1948_v1 }
 0x30e   :  { %v2104_v53 = vadd.f32 %v2103_v18, %v2102_v62  ;;  %v2263_v0 = vrot.slane %v2262_v22, 4  ;;  %v2101_v55 = vadd.f32 %v2100_v52, %v2099_v37  ;;  %v2260_v47 = vrot.slane %v2259_v2, 1 }
 0x30f   :  { %v1980_v11 = vmul.f32 %v1964_v8, %v1898_v34  ;;  %v2659_v34 = vld [vmem:[%s4001_s4] ss:$0 sm:$0xff] }
 0x310   :  { %v2105_v21 = vrot.slane %v2104_v53, 2  ;;  %v2264_v20 = vadd.f32 %v2263_v0, %v2262_v22  ;;  %v2310_v6 = vsel %vm2300_vm7, %v2101_v55, %v2309_v10  ;;  %v2226_v10 = vadd.f32 %v2225_v35, %v2224_v4 }
 0x311   :  { %v2002_v14 = vmul.f32 %v3870_v23, %v1980_v11  ;;  %v2261_v41 = vadd.f32 %v2260_v47, %v2259_v2 }
 0x312   :  { %v2265_v12 = vrot.slane %v2264_v20, 2  ;;  %v2106_v44 = vadd.f32 %v2105_v21, %v2104_v53  ;;  %v2338_v30 = vsel %vm2292_vm3, %v2233_v15, %v2226_v10 }
 0x313   :  { %v2109_v26 = vsel %vm2003_vm2, %v2002_v14, 0.0  ;;  %v2147_v63 = vrot.slane %v2002_v14, 4  ;;  %v2339_v62 = vsel %vm2294_vm4, %v2240_v48, %v2338_v30 }
 0x314   :  { %v2110_v54 = vrot.slane %v2109_v26, 4  ;;  %v2107_v32 = vrot.slane %v2106_v44, 1  ;;  %v2266_v13 = vadd.f32 %v2265_v12, %v2264_v20  ;;  %v2340_v1 = vsel %vm2296_vm5, %v2247_v33, %v2339_v62 }
 0x315   :  { %v2269_v60 = vsel %vm2003_vm2, %v2147_v63, 0.0  ;;  %v2341_v18 = vsel %vm2298_vm6, %v2254_v39, %v2340_v1 }
 0x316   :  { %v2111_v9 = vadd.f32 %v2110_v54, %v2109_v26  ;;  %v2270_v28 = vrot.slane %v2269_v60, 4  ;;  %v2108_v23 = vadd.f32 %v2107_v32, %v2106_v44  ;;  %v2267_v27 = vrot.slane %v2266_v13, 1 }
 0x317   :  { %v2342_v31 = vsel %vm2300_vm7, %v2261_v41, %v2341_v18 }
 0x318   :  { %v2271_v50 = vadd.f32 %v2270_v28, %v2269_v60  ;;  %v2112_v45 = vrot.slane %v2111_v9, 2  ;;  %v2311_v57 = vsel %vm2302_vm8, %v2108_v23, %v2310_v6  ;;  %v2268_v3 = vadd.f32 %v2267_v27, %v2266_v13 }
 0x31a   :  { %v2272_v36 = vrot.slane %v2271_v50, 2  ;;  %v2113_v49 = vadd.f32 %v2112_v45, %v2111_v9  ;;  %v2343_v22 = vsel %vm2302_vm8, %v2268_v3, %v2342_v31 }
 0x31c   :  { %v2273_v25 = vadd.f32 %v2272_v36, %v2271_v50  ;;  %v2114_v37 = vrot.slane %v2113_v49, 1 }
 0x31e   :  { %v2274_v40 = vrot.slane %v2273_v25, 1  ;;  %v2115_v51 = vadd.f32 %v2114_v37, %v2113_v49 }
 0x320   :  { %v2275_v52 = vadd.f32 %v2274_v40, %v2273_v25  ;;  %v2312_v16 = vsel %vm2304_vm9, %v2115_v51, %v2311_v57 }
 0x322   :  { %v2344_v8 = vsel %vm2304_vm9, %v2275_v52, %v2343_v22 }
 0x323   :  { %2347 = vrot.lane.b32.xlu0 %v2344_v8, %s2815_s6 }
 0x33c   :  { %v2346_v56 = vpop.permute.xlu2 %2345 }
 0x33d   :  { %v2351_v61 = vsel %vm95_vm0, %v3936_v17, %v2346_v56 }
 0x33e   :  { %2640 = vmatmul.msk.f32.vlgmr.msrb.gmra.mxu3 %vm1355_vm1, %v2351_v61 }
 0x395   :  { %v2348_v53 = vpop.permute.xlu0 %2347 }
 0x396   :  { %v2352_v0 = vsel %vm95_vm0, %v2312_v16, %v2348_v53 }
 0x397   :  { %2641 = vmatmul.msk.f32.gmra.mxu3 %vm1355_vm1, %v2352_v0 }
 0x3c1   :  { %v2388_v55 = vpop.f32.mrf.mxu3 }
 0x3c2   :  { %v2389_v59 = vadd.f32 %v2659_v34, %v2388_v55 }
 0x3c4   :  { %2394 = vst [vmem:[#allocation7] sm:$0xff] %v2389_v59 }
 0x41a   :  { %v2391_v17 = vpop.f32.mrf.mxu3 }
 0x41b   :  { %v2392_v46 = vadd.f32 %v2659_v34, %v2391_v17 }
 0x41d   :  { %2395 = vst [vmem:[#allocation7 + $0x8] sm:$0xff] %v2392_v46 }
 0x41e   :  { %2408 = dma.vmem_to_hbm [thread:$0]  %s2401_s23, 256, %s2403_s26, [#allocation4], %s2811_s9, %s2811_s9, %s2812_s10  }
 0x41f   :  { %2808 = dma.done.wait [#allocation4], 256  }
 0x420   :  { %2809 = vsyncadd [#allocation4], 4294967040 }
 0x421   :  { %2413 = vsyncpa [#allocation3], 1 }
 0x422   :  { %2414 = vsyncpa [#allocation6], 1 }
 0x423   :  { %2415 = vsyncpa [#allocation4], 1 }

</bundles_post_ra>
